<compile_context>
chip_gen: v5e
topology: v5e:2x2
jax: 0.10.0
libtpu: 0.0.40
codegen_flags: <defaults>
</compile_context>

<pallas_src>
import functools

import jax
import jax.numpy as jnp
from jax.experimental import pallas as pl
from jax.experimental.pallas import tpu as pltpu

LN_EPS = 1e-5


def _cdiv(a, b):
    return -(-a // b)


def _fused_kernel(x_ref, w_ref, p_ref, o_ref, acc_ref, *,
                  nb, n_total, lp, inv_n, group_stats_by_matmul):
    """One (b, L-tile, MSA-block) grid step.

    x_ref   : (1, nb, tl, Cp) bf16  -- nb MSA slices of a (tl, Cp) row tile
    w_ref   : (4, Cp, Cp)     bf16  -- block-diag W1, W2, W3 and group-mean M
    p_ref   : (8, Cp)         f32   -- rows: b1, b2, b3, gamma, beta (tiled)
    o_ref   : (1, tl, Cp)     f32   -- mean over the MSA axis
    acc_ref : (tl, Cp)        f32   -- resident accumulator across the n axis
    """
    tl = acc_ref.shape[0]
    i = pl.program_id(1)
    n = pl.program_id(2)

    @pl.when(n == 0)
    def _():
        acc_ref[...] = jnp.zeros_like(acc_ref)

    p = p_ref[...]                                   # (8, Cp) f32
    b1, b2, b3 = p[0:1], p[1:2], p[2:3]

    w1, w2, w3, m = w_ref[0], w_ref[1], w_ref[2], w_ref[3]

    need_l_mask = (lp % tl) != 0
    if need_l_mask:
        row = jax.lax.broadcasted_iota(jnp.int32, (tl, 1), 0)
        l_valid = (i * tl + row) < lp

    def one_group(g):
        xg = x_ref[0, g]                             # (tl, Cp) bf16
        if need_l_mask:
            # zero padded tail rows so nothing non-finite flows through LN
            xg = jnp.where(l_valid, xg, jnp.zeros_like(xg))
        x32 = xg.astype(jnp.float32)

        # Three block-diagonal matmuls on the MXU (bf16 operands, f32 acc).
        h = jnp.dot(xg, w1, preferred_element_type=jnp.float32) + b1
        h = jnp.maximum(h, 0.0)
        h = jnp.dot(h.astype(jnp.bfloat16), w2,
                    preferred_element_type=jnp.float32) + b2
        h = jnp.maximum(h, 0.0)
        h = jnp.dot(h.astype(jnp.bfloat16), w3,
                    preferred_element_type=jnp.float32) + b3

        y = h + x32                                  # residual, f32

        # LayerNorm per original C-feature group (each 64-lane group).
        if group_stats_by_matmul:
            mu = jnp.dot(y.astype(jnp.bfloat16), m,
                         preferred_element_type=jnp.float32)
            d = y - mu
            var = jnp.dot((d * d).astype(jnp.bfloat16), m,
                          preferred_element_type=jnp.float32)
        else:
            mu = jnp.mean(y, axis=-1, keepdims=True)
            d = y - mu
            var = jnp.mean(d * d, axis=-1, keepdims=True)
        yn = d * jax.lax.rsqrt(var + LN_EPS)

        # gamma/beta and 1/N are hoisted to the epilogue (exact: constant in N)
        acc_ref[...] += yn

    need_n_guard = (n_total % nb) != 0
    for g in range(nb):                              # static unroll over slices
        if need_n_guard:
            pl.when(n * nb + g < n_total)(functools.partial(one_group, g))
        else:
            one_group(g)

    @pl.when(n == pl.num_programs(2) - 1)
    def _():
        gamma, beta = p[3:4], p[4:5]
        o_ref[0] = ((acc_ref[...] * inv_n) * gamma + beta).astype(o_ref.dtype)


def _run_fused(x4, params, *, tl_cap=512, nb_cap=8):
    """x4: (B, N, L, C) -> (B, L, C): mean over N of (transition + LayerNorm)."""
    B, N, L, C = x4.shape
    w1, b1, w2, b2, w3, b3, gamma, beta = params

    # ---- feature packing: (L, C) -> (L/P, P*C) so the MXU sees K=N=P*C ----
    if L % 4 == 0:
        P = 4
    elif L % 2 == 0:
        P = 2
    else:
        P = 1
    Lp, Cp = L // P, P * C

    # bf16 activations: halves the dominant HBM read stream (was f32).
    x = x4.astype(jnp.bfloat16).reshape(B, N, Lp, Cp)

    def blockdiag(blk):
        out = jnp.zeros((Cp, Cp), jnp.float32)
        for g in range(P):
            out = out.at[g * C:(g + 1) * C, g * C:(g + 1) * C].set(blk)
        return out

    mean_blk = jnp.full((C, C), 1.0 / C, jnp.float32)
    wstack = jnp.stack([blockdiag(w1), blockdiag(w2), blockdiag(w3),
                        blockdiag(mean_blk)]).astype(jnp.bfloat16)

    tile = lambda v: jnp.tile(v.astype(jnp.float32), P)      # (Cp,)
    pvec = jnp.zeros((8, Cp), jnp.float32)
    pvec = pvec.at[0].set(tile(b1)).at[1].set(tile(b2)).at[2].set(tile(b3))
    pvec = pvec.at[3].set(tile(gamma)).at[4].set(tile(beta))

    # ---- tiling: big row tiles; fold several MSA slices when L is small ----
    if Lp >= tl_cap:
        tl, nb = tl_cap, 1
    else:
        tl = Lp
        nb = min(N, nb_cap, max(1, _cdiv(256, max(Lp, 1))))
    # v7x has 2 TensorCores: make sure the parallel axes have >= 2 grid steps.
    if B * _cdiv(Lp, tl) < 2 and Lp > 8:
        tl = max(8, ((_cdiv(Lp, 2) + 7) // 8) * 8)

    grid = (B, _cdiv(Lp, tl), _cdiv(N, nb))

    kernel = functools.partial(
        _fused_kernel, nb=nb, n_total=N, lp=Lp, inv_n=1.0 / N,
        group_stats_by_matmul=(P > 1))

    out = pl.pallas_call(
        kernel,
        out_shape=jax.ShapeDtypeStruct((B, Lp, Cp), jnp.float32),
        grid_spec=pltpu.PrefetchScalarGridSpec(
            num_scalar_prefetch=0,
            grid=grid,
            in_specs=[
                pl.BlockSpec((1, nb, tl, Cp), lambda b, i, n: (b, n, i, 0)),
                pl.BlockSpec((4, Cp, Cp), lambda b, i, n: (0, 0, 0)),   # weights
                pl.BlockSpec((8, Cp), lambda b, i, n: (0, 0)),          # b/gamma/beta
            ],
            out_specs=pl.BlockSpec((1, tl, Cp), lambda b, i, n: (b, i, 0)),
            scratch_shapes=[pltpu.VMEM((tl, Cp), jnp.float32)],
        ),
        compiler_params=pltpu.CompilerParams(
            dimension_semantics=("parallel", "parallel", "arbitrary")),
    )(x, wstack, pvec)

    return out.reshape(B, L, C)


def msa2single(msa, params):
    """JAX equivalent of MSA2SINGLE.forward (inference mode, dropout off)."""
    # TODO(synk): nn.Dropout is identity at inference time; training-mode dropout
    # is not implemented.
    if msa.ndim == 4:
        s = _run_fused(msa, params)                  # (B, L, C)
        if s.shape[1] == 1:                          # torch .squeeze(1)
            s = jnp.squeeze(s, axis=1)
        return s
    elif msa.ndim == 3:
        return _run_fused(msa[:, None], params)      # N=1, mean over 1 == id
    raise ValueError("msa must be 3-D or 4-D")


def init_params(key, c):
    """Deterministic synthetic parameters (shapes from the PyTorch module)."""
    ks = jax.random.split(key, 6)
    scale = 1.0 / jnp.sqrt(c)
    w1 = jax.random.normal(ks[0], (c, c), jnp.float32) * scale
    b1 = jax.random.normal(ks[1], (c,), jnp.float32) * 0.01
    w2 = jax.random.normal(ks[2], (c, c), jnp.float32) * scale
    b2 = jax.random.normal(ks[3], (c,), jnp.float32) * 0.01
    w3 = jax.random.normal(ks[4], (c, c), jnp.float32) * scale * 0.1
    b3 = jax.random.normal(ks[5], (c,), jnp.float32) * 0.01
    gamma = jnp.ones((c,), jnp.float32)
    beta = jnp.zeros((c,), jnp.float32)
    return (w1, b1, w2, b2, w3, b3, gamma, beta)


def _reference(msa, params):
    """Pure-JAX f32 reference (matches the PyTorch module semantics)."""
    w1, b1, w2, b2, w3, b3, gamma, beta = params
    s0 = msa.astype(jnp.float32)
    h = jnp.maximum(s0 @ w1 + b1, 0.0)
    h = jnp.maximum(h @ w2 + b2, 0.0)
    h = h @ w3 + b3
    y = h + s0
    mu = jnp.mean(y, axis=-1, keepdims=True)
    var = jnp.mean((y - mu) ** 2, axis=-1, keepdims=True)
    y = (y - mu) / jnp.sqrt(var + LN_EPS) * gamma + beta
    if msa.ndim == 4:
        s = jnp.sum(y, axis=1) / msa.shape[1]
        if s.shape[1] == 1:
            s = jnp.squeeze(s, axis=1)
        return s
    return y


if __name__ == "__main__":
    key = jax.random.PRNGKey(0)
    d_msa = 64                       # module default
    B, N, L = 2, 3, 8                # small shapes: batch, num MSA seqs, seq len
    k_in, k_par = jax.random.split(key)
    msa = jax.random.normal(k_in, (B, N, L, d_msa), jnp.float32)

    params = init_params(k_par, d_msa)

    # 4-D path (fused mean over the MSA axis)
    out = jax.block_until_ready(msa2single(msa, params))
    ref = _reference(msa, params)
    assert out.shape == (B, L, d_msa), out.shape
    # bf16 activations / MXU operands (f32 accumulation) -> loose tolerance
    assert jnp.allclose(out, ref, atol=2e-2, rtol=2e-2), "4D mismatch vs reference"

    # 3-D path (no reduction)
    out3 = jax.block_until_ready(msa2single(msa[:, 0], params))
    ref3 = _reference(msa[:, 0], params)
    assert out3.shape == (B, L, d_msa), out3.shape
    assert jnp.allclose(out3, ref3, atol=2e-2, rtol=2e-2), "3D mismatch vs reference"

    print("KERNEL_OK")
</pallas_src>

<mosaic_0001>
module attributes {stable_mosaic.version = 11 : i64} {
  func.func @_fused_kernel(%arg0: i32, %arg1: i32, %arg2: i32, %arg3: memref<1x3x2x256xbf16, #tpu.memory_space<vmem>>, %arg4: memref<4x256x256xbf16, #tpu.memory_space<vmem>>, %arg5: memref<8x256xf32, #tpu.memory_space<vmem>>, %arg6: memref<1x2x256xf32, #tpu.memory_space<vmem>>, %arg7: memref<2x256xf32, #tpu.memory_space<vmem>>) attributes {dimension_semantics = [#tpu.dimension_semantics<parallel>, #tpu.dimension_semantics<parallel>, #tpu.dimension_semantics<arbitrary>], iteration_bounds = array<i64: 2, 1, 1>, scalar_prefetch = 0 : i64, scratch_operands = 1 : i64, tpu.core_type = #tpu.core_type<tc>, window_params = [{transform_indices = @transform_0, window_bounds = array<i64: 1, 3, 2, 256>}, {pipeline_mode = #tpu.pipeline_mode<synchronous>, transform_indices = @transform_1, window_bounds = array<i64: 4, 256, 256>}, {pipeline_mode = #tpu.pipeline_mode<synchronous>, transform_indices = @transform_2, window_bounds = array<i64: 8, 256>}, {transform_indices = @transform_3, window_bounds = array<i64: 1, 2, 256>}]} {
    %c0_i32 = arith.constant 0 : i32
    %0 = arith.cmpi eq, %arg2, %c0_i32 : i32
    %1 = arith.extui %0 : i1 to i32
    %c0_i32_0 = arith.constant 0 : i32
    %2 = arith.cmpi ne, %1, %c0_i32_0 : i32
    scf.if %2 {
      %cst_60 = arith.constant 0.000000e+00 : f32
      %114 = vector.broadcast %cst_60 : f32 to vector<2x256xf32>
      %c0_61 = arith.constant 0 : index
      %c0_62 = arith.constant 0 : index
      %115 = vector.load %arg7[%c0_61, %c0_62] : memref<2x256xf32, #tpu.memory_space<vmem>>, vector<2x256xf32>
      tpu.vector_store %arg7[%c0_61, %c0_62], %114 {strides = array<i32>} : memref<2x256xf32, #tpu.memory_space<vmem>>, vector<2x256xf32>,
    } else {
    }
    %c0 = arith.constant 0 : index
    %c0_1 = arith.constant 0 : index
    %3 = vector.load %arg5[%c0, %c0_1] : memref<8x256xf32, #tpu.memory_space<vmem>>, vector<8x256xf32>
    %4 = vector.extract_strided_slice %3 {offsets = [0, 0], sizes = [1, 256], strides = [1, 1]} : vector<8x256xf32> to vector<1x256xf32>
    %5 = vector.extract_strided_slice %3 {offsets = [1, 0], sizes = [1, 256], strides = [1, 1]} : vector<8x256xf32> to vector<1x256xf32>
    %6 = vector.extract_strided_slice %3 {offsets = [2, 0], sizes = [1, 256], strides = [1, 1]} : vector<8x256xf32> to vector<1x256xf32>
    %c0_2 = arith.constant 0 : index
    %c0_3 = arith.constant 0 : index
    %c0_4 = arith.constant 0 : index
    %7 = vector.load %arg4[%c0_2, %c0_3, %c0_4] : memref<4x256x256xbf16, #tpu.memory_space<vmem>>, vector<1x256x256xbf16>
    %8 = vector.shape_cast %7 : vector<1x256x256xbf16> to vector<256x256xbf16>
    %c1 = arith.constant 1 : index
    %c0_5 = arith.constant 0 : index
    %c0_6 = arith.constant 0 : index
    %9 = vector.load %arg4[%c1, %c0_5, %c0_6] : memref<4x256x256xbf16, #tpu.memory_space<vmem>>, vector<1x256x256xbf16>
    %10 = vector.shape_cast %9 : vector<1x256x256xbf16> to vector<256x256xbf16>
    %c2 = arith.constant 2 : index
    %c0_7 = arith.constant 0 : index
    %c0_8 = arith.constant 0 : index
    %11 = vector.load %arg4[%c2, %c0_7, %c0_8] : memref<4x256x256xbf16, #tpu.memory_space<vmem>>, vector<1x256x256xbf16>
    %12 = vector.shape_cast %11 : vector<1x256x256xbf16> to vector<256x256xbf16>
    %c3 = arith.constant 3 : index
    %c0_9 = arith.constant 0 : index
    %c0_10 = arith.constant 0 : index
    %13 = vector.load %arg4[%c3, %c0_9, %c0_10] : memref<4x256x256xbf16, #tpu.memory_space<vmem>>, vector<1x256x256xbf16>
    %14 = vector.shape_cast %13 : vector<1x256x256xbf16> to vector<256x256xbf16>
    %c0_11 = arith.constant 0 : index
    %c0_12 = arith.constant 0 : index
    %c0_13 = arith.constant 0 : index
    %c0_14 = arith.constant 0 : index
    %15 = vector.load %arg3[%c0_11, %c0_12, %c0_13, %c0_14] : memref<1x3x2x256xbf16, #tpu.memory_space<vmem>>, vector<1x1x2x256xbf16>
    %16 = vector.shape_cast %15 : vector<1x1x2x256xbf16> to vector<2x256xbf16>
    %17 = arith.extf %16 : vector<2x256xbf16> to vector<2x256xf32>
    %cst = arith.constant dense<0.000000e+00> : vector<2x256xf32>
    %18 = tpu.matmul %16, %8, %cst {dimension_numbers = #tpu.dot_dimension_numbers<[1], [0], [0], [1], [0, 0, 1, 1], [], []>} : vector<2x256xbf16>, vector<256x256xbf16>, vector<2x256xf32> -> vector<2x256xf32>
    %19 = vector.broadcast %4 : vector<1x256xf32> to vector<2x256xf32>
    %20 = arith.addf %18, %19 : vector<2x256xf32>
    %cst_15 = arith.constant 0.000000e+00 : f32
    %21 = vector.broadcast %cst_15 : f32 to vector<2x256xf32>
    %22 = arith.maximumf %20, %21 : vector<2x256xf32>
    %23 = arith.truncf %22 : vector<2x256xf32> to vector<2x256xbf16>
    %cst_16 = arith.constant dense<0.000000e+00> : vector<2x256xf32>
    %24 = tpu.matmul %23, %10, %cst_16 {dimension_numbers = #tpu.dot_dimension_numbers<[1], [0], [0], [1], [0, 0, 1, 1], [], []>} : vector<2x256xbf16>, vector<256x256xbf16>, vector<2x256xf32> -> vector<2x256xf32>
    %25 = vector.broadcast %5 : vector<1x256xf32> to vector<2x256xf32>
    %26 = arith.addf %24, %25 : vector<2x256xf32>
    %cst_17 = arith.constant 0.000000e+00 : f32
    %27 = vector.broadcast %cst_17 : f32 to vector<2x256xf32>
    %28 = arith.maximumf %26, %27 : vector<2x256xf32>
    %29 = arith.truncf %28 : vector<2x256xf32> to vector<2x256xbf16>
    %cst_18 = arith.constant dense<0.000000e+00> : vector<2x256xf32>
    %30 = tpu.matmul %29, %12, %cst_18 {dimension_numbers = #tpu.dot_dimension_numbers<[1], [0], [0], [1], [0, 0, 1, 1], [], []>} : vector<2x256xbf16>, vector<256x256xbf16>, vector<2x256xf32> -> vector<2x256xf32>
    %31 = vector.broadcast %6 : vector<1x256xf32> to vector<2x256xf32>
    %32 = arith.addf %30, %31 : vector<2x256xf32>
    %33 = arith.addf %32, %17 : vector<2x256xf32>
    %34 = arith.truncf %33 : vector<2x256xf32> to vector<2x256xbf16>
    %cst_19 = arith.constant dense<0.000000e+00> : vector<2x256xf32>
    %35 = tpu.matmul %34, %14, %cst_19 {dimension_numbers = #tpu.dot_dimension_numbers<[1], [0], [0], [1], [0, 0, 1, 1], [], []>} : vector<2x256xbf16>, vector<256x256xbf16>, vector<2x256xf32> -> vector<2x256xf32>
    %36 = arith.subf %33, %35 : vector<2x256xf32>
    %37 = arith.mulf %36, %36 : vector<2x256xf32>
    %38 = arith.truncf %37 : vector<2x256xf32> to vector<2x256xbf16>
    %cst_20 = arith.constant dense<0.000000e+00> : vector<2x256xf32>
    %39 = tpu.matmul %38, %14, %cst_20 {dimension_numbers = #tpu.dot_dimension_numbers<[1], [0], [0], [1], [0, 0, 1, 1], [], []>} : vector<2x256xbf16>, vector<256x256xbf16>, vector<2x256xf32> -> vector<2x256xf32>
    %cst_21 = arith.constant 9.99999974E-6 : f32
    %40 = vector.broadcast %cst_21 : f32 to vector<2x256xf32>
    %41 = arith.addf %39, %40 : vector<2x256xf32>
    %42 = math.rsqrt %41 : vector<2x256xf32>
    %43 = arith.mulf %36, %42 : vector<2x256xf32>
    %c0_22 = arith.constant 0 : index
    %c0_23 = arith.constant 0 : index
    %44 = vector.load %arg7[%c0_22, %c0_23] : memref<2x256xf32, #tpu.memory_space<vmem>>, vector<2x256xf32>
    %45 = arith.addf %44, %43 : vector<2x256xf32>
    %c0_24 = arith.constant 0 : index
    %c0_25 = arith.constant 0 : index
    %46 = vector.load %arg7[%c0_24, %c0_25] : memref<2x256xf32, #tpu.memory_space<vmem>>, vector<2x256xf32>
    tpu.vector_store %arg7[%c0_24, %c0_25], %45 {strides = array<i32>} : memref<2x256xf32, #tpu.memory_space<vmem>>, vector<2x256xf32>,
    %c0_26 = arith.constant 0 : index
    %c1_27 = arith.constant 1 : index
    %c0_28 = arith.constant 0 : index
    %c0_29 = arith.constant 0 : index
    %47 = vector.load %arg3[%c0_26, %c1_27, %c0_28, %c0_29] : memref<1x3x2x256xbf16, #tpu.memory_space<vmem>>, vector<1x1x2x256xbf16>
    %48 = vector.shape_cast %47 : vector<1x1x2x256xbf16> to vector<2x256xbf16>
    %49 = arith.extf %48 : vector<2x256xbf16> to vector<2x256xf32>
    %cst_30 = arith.constant dense<0.000000e+00> : vector<2x256xf32>
    %50 = tpu.matmul %48, %8, %cst_30 {dimension_numbers = #tpu.dot_dimension_numbers<[1], [0], [0], [1], [0, 0, 1, 1], [], []>} : vector<2x256xbf16>, vector<256x256xbf16>, vector<2x256xf32> -> vector<2x256xf32>
    %51 = vector.broadcast %4 : vector<1x256xf32> to vector<2x256xf32>
    %52 = arith.addf %50, %51 : vector<2x256xf32>
    %cst_31 = arith.constant 0.000000e+00 : f32
    %53 = vector.broadcast %cst_31 : f32 to vector<2x256xf32>
    %54 = arith.maximumf %52, %53 : vector<2x256xf32>
    %55 = arith.truncf %54 : vector<2x256xf32> to vector<2x256xbf16>
    %cst_32 = arith.constant dense<0.000000e+00> : vector<2x256xf32>
    %56 = tpu.matmul %55, %10, %cst_32 {dimension_numbers = #tpu.dot_dimension_numbers<[1], [0], [0], [1], [0, 0, 1, 1], [], []>} : vector<2x256xbf16>, vector<256x256xbf16>, vector<2x256xf32> -> vector<2x256xf32>
    %57 = vector.broadcast %5 : vector<1x256xf32> to vector<2x256xf32>
    %58 = arith.addf %56, %57 : vector<2x256xf32>
    %cst_33 = arith.constant 0.000000e+00 : f32
    %59 = vector.broadcast %cst_33 : f32 to vector<2x256xf32>
    %60 = arith.maximumf %58, %59 : vector<2x256xf32>
    %61 = arith.truncf %60 : vector<2x256xf32> to vector<2x256xbf16>
    %cst_34 = arith.constant dense<0.000000e+00> : vector<2x256xf32>
    %62 = tpu.matmul %61, %12, %cst_34 {dimension_numbers = #tpu.dot_dimension_numbers<[1], [0], [0], [1], [0, 0, 1, 1], [], []>} : vector<2x256xbf16>, vector<256x256xbf16>, vector<2x256xf32> -> vector<2x256xf32>
    %63 = vector.broadcast %6 : vector<1x256xf32> to vector<2x256xf32>
    %64 = arith.addf %62, %63 : vector<2x256xf32>
    %65 = arith.addf %64, %49 : vector<2x256xf32>
    %66 = arith.truncf %65 : vector<2x256xf32> to vector<2x256xbf16>
    %cst_35 = arith.constant dense<0.000000e+00> : vector<2x256xf32>
    %67 = tpu.matmul %66, %14, %cst_35 {dimension_numbers = #tpu.dot_dimension_numbers<[1], [0], [0], [1], [0, 0, 1, 1], [], []>} : vector<2x256xbf16>, vector<256x256xbf16>, vector<2x256xf32> -> vector<2x256xf32>
    %68 = arith.subf %65, %67 : vector<2x256xf32>
    %69 = arith.mulf %68, %68 : vector<2x256xf32>
    %70 = arith.truncf %69 : vector<2x256xf32> to vector<2x256xbf16>
    %cst_36 = arith.constant dense<0.000000e+00> : vector<2x256xf32>
    %71 = tpu.matmul %70, %14, %cst_36 {dimension_numbers = #tpu.dot_dimension_numbers<[1], [0], [0], [1], [0, 0, 1, 1], [], []>} : vector<2x256xbf16>, vector<256x256xbf16>, vector<2x256xf32> -> vector<2x256xf32>
    %cst_37 = arith.constant 9.99999974E-6 : f32
    %72 = vector.broadcast %cst_37 : f32 to vector<2x256xf32>
    %73 = arith.addf %71, %72 : vector<2x256xf32>
    %74 = math.rsqrt %73 : vector<2x256xf32>
    %75 = arith.mulf %68, %74 : vector<2x256xf32>
    %c0_38 = arith.constant 0 : index
    %c0_39 = arith.constant 0 : index
    %76 = vector.load %arg7[%c0_38, %c0_39] : memref<2x256xf32, #tpu.memory_space<vmem>>, vector<2x256xf32>
    %77 = arith.addf %76, %75 : vector<2x256xf32>
    %c0_40 = arith.constant 0 : index
    %c0_41 = arith.constant 0 : index
    %78 = vector.load %arg7[%c0_40, %c0_41] : memref<2x256xf32, #tpu.memory_space<vmem>>, vector<2x256xf32>
    tpu.vector_store %arg7[%c0_40, %c0_41], %77 {strides = array<i32>} : memref<2x256xf32, #tpu.memory_space<vmem>>, vector<2x256xf32>,
    %c0_42 = arith.constant 0 : index
    %c2_43 = arith.constant 2 : index
    %c0_44 = arith.constant 0 : index
    %c0_45 = arith.constant 0 : index
    %79 = vector.load %arg3[%c0_42, %c2_43, %c0_44, %c0_45] : memref<1x3x2x256xbf16, #tpu.memory_space<vmem>>, vector<1x1x2x256xbf16>
    %80 = vector.shape_cast %79 : vector<1x1x2x256xbf16> to vector<2x256xbf16>
    %81 = arith.extf %80 : vector<2x256xbf16> to vector<2x256xf32>
    %cst_46 = arith.constant dense<0.000000e+00> : vector<2x256xf32>
    %82 = tpu.matmul %80, %8, %cst_46 {dimension_numbers = #tpu.dot_dimension_numbers<[1], [0], [0], [1], [0, 0, 1, 1], [], []>} : vector<2x256xbf16>, vector<256x256xbf16>, vector<2x256xf32> -> vector<2x256xf32>
    %83 = vector.broadcast %4 : vector<1x256xf32> to vector<2x256xf32>
    %84 = arith.addf %82, %83 : vector<2x256xf32>
    %cst_47 = arith.constant 0.000000e+00 : f32
    %85 = vector.broadcast %cst_47 : f32 to vector<2x256xf32>
    %86 = arith.maximumf %84, %85 : vector<2x256xf32>
    %87 = arith.truncf %86 : vector<2x256xf32> to vector<2x256xbf16>
    %cst_48 = arith.constant dense<0.000000e+00> : vector<2x256xf32>
    %88 = tpu.matmul %87, %10, %cst_48 {dimension_numbers = #tpu.dot_dimension_numbers<[1], [0], [0], [1], [0, 0, 1, 1], [], []>} : vector<2x256xbf16>, vector<256x256xbf16>, vector<2x256xf32> -> vector<2x256xf32>
    %89 = vector.broadcast %5 : vector<1x256xf32> to vector<2x256xf32>
    %90 = arith.addf %88, %89 : vector<2x256xf32>
    %cst_49 = arith.constant 0.000000e+00 : f32
    %91 = vector.broadcast %cst_49 : f32 to vector<2x256xf32>
    %92 = arith.maximumf %90, %91 : vector<2x256xf32>
    %93 = arith.truncf %92 : vector<2x256xf32> to vector<2x256xbf16>
    %cst_50 = arith.constant dense<0.000000e+00> : vector<2x256xf32>
    %94 = tpu.matmul %93, %12, %cst_50 {dimension_numbers = #tpu.dot_dimension_numbers<[1], [0], [0], [1], [0, 0, 1, 1], [], []>} : vector<2x256xbf16>, vector<256x256xbf16>, vector<2x256xf32> -> vector<2x256xf32>
    %95 = vector.broadcast %6 : vector<1x256xf32> to vector<2x256xf32>
    %96 = arith.addf %94, %95 : vector<2x256xf32>
    %97 = arith.addf %96, %81 : vector<2x256xf32>
    %98 = arith.truncf %97 : vector<2x256xf32> to vector<2x256xbf16>
    %cst_51 = arith.constant dense<0.000000e+00> : vector<2x256xf32>
    %99 = tpu.matmul %98, %14, %cst_51 {dimension_numbers = #tpu.dot_dimension_numbers<[1], [0], [0], [1], [0, 0, 1, 1], [], []>} : vector<2x256xbf16>, vector<256x256xbf16>, vector<2x256xf32> -> vector<2x256xf32>
    %100 = arith.subf %97, %99 : vector<2x256xf32>
    %101 = arith.mulf %100, %100 : vector<2x256xf32>
    %102 = arith.truncf %101 : vector<2x256xf32> to vector<2x256xbf16>
    %cst_52 = arith.constant dense<0.000000e+00> : vector<2x256xf32>
    %103 = tpu.matmul %102, %14, %cst_52 {dimension_numbers = #tpu.dot_dimension_numbers<[1], [0], [0], [1], [0, 0, 1, 1], [], []>} : vector<2x256xbf16>, vector<256x256xbf16>, vector<2x256xf32> -> vector<2x256xf32>
    %cst_53 = arith.constant 9.99999974E-6 : f32
    %104 = vector.broadcast %cst_53 : f32 to vector<2x256xf32>
    %105 = arith.addf %103, %104 : vector<2x256xf32>
    %106 = math.rsqrt %105 : vector<2x256xf32>
    %107 = arith.mulf %100, %106 : vector<2x256xf32>
    %c0_54 = arith.constant 0 : index
    %c0_55 = arith.constant 0 : index
    %108 = vector.load %arg7[%c0_54, %c0_55] : memref<2x256xf32, #tpu.memory_space<vmem>>, vector<2x256xf32>
    %109 = arith.addf %108, %107 : vector<2x256xf32>
    %c0_56 = arith.constant 0 : index
    %c0_57 = arith.constant 0 : index
    %110 = vector.load %arg7[%c0_56, %c0_57] : memref<2x256xf32, #tpu.memory_space<vmem>>, vector<2x256xf32>
    tpu.vector_store %arg7[%c0_56, %c0_57], %109 {strides = array<i32>} : memref<2x256xf32, #tpu.memory_space<vmem>>, vector<2x256xf32>,
    %c0_i32_58 = arith.constant 0 : i32
    %111 = arith.cmpi eq, %arg2, %c0_i32_58 : i32
    %112 = arith.extui %111 : i1 to i32
    %c0_i32_59 = arith.constant 0 : i32
    %113 = arith.cmpi ne, %112, %c0_i32_59 : i32
    scf.if %113 {
      %114 = vector.extract_strided_slice %3 {offsets = [3, 0], sizes = [1, 256], strides = [1, 1]} : vector<8x256xf32> to vector<1x256xf32>
      %115 = vector.extract_strided_slice %3 {offsets = [4, 0], sizes = [1, 256], strides = [1, 1]} : vector<8x256xf32> to vector<1x256xf32>
      %c0_60 = arith.constant 0 : index
      %c0_61 = arith.constant 0 : index
      %116 = vector.load %arg7[%c0_60, %c0_61] : memref<2x256xf32, #tpu.memory_space<vmem>>, vector<2x256xf32>
      %cst_62 = arith.constant 0.333333343 : f32
      %117 = vector.broadcast %cst_62 : f32 to vector<2x256xf32>
      %118 = arith.mulf %116, %117 : vector<2x256xf32>
      %119 = vector.broadcast %114 : vector<1x256xf32> to vector<2x256xf32>
      %120 = arith.mulf %118, %119 : vector<2x256xf32>
      %121 = vector.broadcast %115 : vector<1x256xf32> to vector<2x256xf32>
      %122 = arith.addf %120, %121 : vector<2x256xf32>
      %c0_63 = arith.constant 0 : index
      %c0_64 = arith.constant 0 : index
      %c0_65 = arith.constant 0 : index
      %123 = vector.load %arg6[%c0_63, %c0_64, %c0_65] : memref<1x2x256xf32, #tpu.memory_space<vmem>>, vector<1x2x256xf32>
      %124 = vector.shape_cast %123 : vector<1x2x256xf32> to vector<2x256xf32>
      %125 = vector.shape_cast %122 : vector<2x256xf32> to vector<1x2x256xf32>
      tpu.vector_store %arg6[%c0_63, %c0_64, %c0_65], %125 {strides = array<i32>} : memref<1x2x256xf32, #tpu.memory_space<vmem>>, vector<1x2x256xf32>,
    } else {
    }
    return
  }
  func.func @transform_0(%arg0: i32, %arg1: i32, %arg2: i32) -> (i32, i32, i32, i32) {
    %c0_i32 = arith.constant 0 : i32
    %c0_i32_0 = arith.constant 0 : i32
    return %arg0, %arg2, %arg1, %c0_i32 : i32, i32, i32, i32
  }
  func.func @transform_1(%arg0: i32, %arg1: i32, %arg2: i32) -> (i32, i32, i32) {
    %c0_i32 = arith.constant 0 : i32
    %c0_i32_0 = arith.constant 0 : i32
    %c0_i32_1 = arith.constant 0 : i32
    %c0_i32_2 = arith.constant 0 : i32
    return %c0_i32, %c0_i32_0, %c0_i32_1 : i32, i32, i32
  }
  func.func @transform_2(%arg0: i32, %arg1: i32, %arg2: i32) -> (i32, i32) {
    %c0_i32 = arith.constant 0 : i32
    %c0_i32_0 = arith.constant 0 : i32
    %c0_i32_1 = arith.constant 0 : i32
    return %c0_i32, %c0_i32_0 : i32, i32
  }
  func.func @transform_3(%arg0: i32, %arg1: i32, %arg2: i32) -> (i32, i32, i32) {
    %c0_i32 = arith.constant 0 : i32
    %c0_i32_0 = arith.constant 0 : i32
    return %arg0, %arg1, %c0_i32 : i32, i32, i32
  }
}

</mosaic_0001>

<bundles_post_ra>
// kernel: tpu_custom_call.1
= control target key start
LH: loop header
LB: loop body
LE: loop exit
PB: predicated region body
PF: predicated region fallthrough
CT: control target
= control target key end

     0   :  { %8 = vsyncpa [#allocation4], 0  ;;  %s4084_s0 = inlined_call_operand.hbm [shape: bf16[2,3,2,256], index: 0, kind: input, shape index: {}]   ;;  %s4085_s1 = inlined_call_operand.hbm [shape: bf16[4,256,256], index: 1, kind: input, shape index: {}]   ;;  %s4086_s2 = inlined_call_operand.hbm [shape: f32[8,256], index: 2, kind: input, shape index: {}]   ;;  %s4087_s3 = inlined_call_operand.hbm [shape: f32[2,2,256], index: 3, kind: output, shape index: {}]  }
   0x1   :  { %10 = vsyncpa [#allocation4 + $0x1], 0 }
   0x2   :  { %11 = vsyncpa [#allocation7], 0 }
   0x3   :  { %12 = vsyncpa [#allocation5], 0 }
   0x4   :  { %14 = vsyncpa [#allocation5 + $0x1], 0  ;;  %s3121_s12 = smov 0   ;;  %s3123_s13 = smov 0  }
   0x5   :  { %s3125_s14 = smov 0   ;;  %s3127_s15 = smov 0  }
   0x6   :  { %s3129_s16 = smov 0   ;;  %s3131_s17 = smov 0  }
   0x7 LB: > { %s2153_s18 = sadd.s32 4294967295, %s3092_s17   ;;  %s2154_s19 = sadd.s32 4294967294, %s3092_s17   ;;  %s3092_s17 = sphi %s3131_s17, %s20_s17   ;;  %s3088_s16 = sphi %s3129_s16, %s4544_s16   ;;  %s3084_s15 = sphi %s3127_s15, %s4543_s15   ;;  %s3080_s14 = sphi %s3125_s14, %s4542_s14   ;;  %s3076_s13 = sphi %s3123_s13, %s4541_s13   ;;  %s3072_s12 = sphi %s3121_s12, %s4540_s12  }
   0x8   : > { %p63_p0 = scmp.ne.s32.totalorder %s3076_s13, %s3072_s12  ;;  %p3155_p1 = scmp.eq.s32.totalorder %s2153_s18, 0 }
   0x9   : > { %p3159_p2 = scmp.eq.s32.totalorder %s2153_s18, 1  ;;  %p137_p3 = scmp.eq.s32.totalorder %s2154_s19, 1 }
   0xa   : > { %p3165_p4 = por %p3155_p1, %p63_p0  ;;  %p2155_p5 = scmp.ge.s32.totalorder %s3092_s17, 1 }
   0xb   : > { %p3170_p6 = por %p137_p3, %p63_p0  ;;  %p144_p7 = scmp.lt.s32.totalorder %s3092_s17, 3 }
   0xc   : > { %s155_s26 = sshll.u32 %s4085_s1, 4  ;;  %s3094_s28 = smov [#allocation6]   ;;  %s156_s26 = int_to_ptr.hbm [resolvable:$true] %s155_s26 }
   0xd   : > { %p3178_p8 = pnand %p2155_p5, %p144_p7  ;;  %s157_s29 = sshll.u32 %s3094_s28, 4  ;;  %s158_s29 = int_to_ptr.vmem [resolvable:$true] %s157_s29 }
   0xe   : > { %p2158_p11 = scmp.ge.s32.totalorder %s3092_s17, 2  ;;  %s170_s5 = sshll.u32 %s4086_s2, 4  ;;  %s171_s5 = int_to_ptr.hbm [resolvable:$true] %s170_s5 }
   0xf   : > { %p2826_p9 = pneg %p3178_p8  ;;  %s3095_s6 = smov 128  }
  0x10   : > { %s3096_s7 = smov 8   ;;  %s3097_s8 = smov [#allocation8]  }
  0x11   : > { %p2827_p10 = pnand %p2826_p9, %p3155_p1  ;;  %s172_s9 = sshll.u32 %s3097_s8, 4  ;;  %s173_s9 = int_to_ptr.vmem [resolvable:$true] %s172_s9 }
  0x12   : > { %s39_s10 = sadd.s32 1, %s3088_s16  ;;  %s50_s11 = sadd.s32 1, %s3080_s14 }
  0x13   : > { %2829 = dma.hbm_to_vmem [thread:$0]  (!%p2827_p10), %s156_s26, 16384, %s158_s29, [#allocation7], %s3095_s6, %s3095_s6, %s3096_s7  }
  0x14   : > { %2832 = dma.hbm_to_vmem [thread:$0]  (!%p2827_p10), %s171_s5, 256, %s173_s9, [#allocation7]  }
  0x15   : > { %p41_p12 = scmp.ge.s32.totalorder %s39_s10, 2  ;;  %p57_p13 = scmp.ne.s32.totalorder %s3080_s14, %s3076_s13 }
  0x16   : > { %p58_p0 = scmp.eq.s32.totalorder %s3092_s17, 0  ;;  %p2843_p3 = scmp.lt.s32.totalorder %s3092_s17, 2 }
  0x17   : > { %s4546_s10 = smov (%p41_p12, %s39_s10), 0  ;;  %p3200_p7 = por %p3159_p2, %p57_p13 }
  0x18   : > { %p59_p5 = por %p58_p0, %p57_p13  ;;  %s43_s19 = ssub.s32 %s3088_s16, %s4546_s10 }
  0x19   : > { %s183_s24 = sand.u32 1, %s3080_s14   ;;  %p48_p9 = scmp.eq.s32.totalorder %s43_s19, 0 }
  0x1a   : > { %s2811_s25 = smul.u32 6, %s183_s24  ;;  %p2834_p10 = pnand %p2843_p3, %p59_p5 }
  0x1b   : > { %s3208_s26 = scalar_select %p48_p9, %s3080_s14, %s50_s11  }
  0x1c   : > { %s2812_s28 = smul.u32 6, %s3088_s16  ;;  %s187_s29 = scalar_lea.vmem [#allocation3], %s2811_s25 }
  0x1d   : > { %s199_s30 = sshll.u32 %s187_s29, 4  ;;  %s184_s7 = scalar_lea.sflag [#allocation4], %s183_s24  ;;  %s200_s30 = int_to_ptr.vmem [resolvable:$true] %s199_s30 }
  0x1e   : > { %s196_s6 = scalar_lea.hbm %s4084_s0, %s2812_s28  ;;  %s3098_s8 = smov 32  }
  0x1f   : > { %s197_s21 = sshll.u32 %s196_s6, 4  ;;  %s3099_s9 = smov 2   ;;  %s198_s21 = int_to_ptr.hbm [resolvable:$true] %s197_s21 }
  0x20   : > { %2836 = dma.hbm_to_vmem [thread:$0]  (!%p2834_p10), %s198_s21, 96, %s200_s30, %s184_s7, %s3098_s8, %s3098_s8, %s3099_s9  }
  0x21   : > { %211 = sbr.rel (%p3178_p8) target bundleno = 1953 (0x7a1), region = 32 }
  0x26   : > { %s3217_s11 = sand.u32 1, %s3076_s13  }
  0x27   : > { %s2813_s19 = smul.u32 6, %s3217_s11  ;;  %s214_s25 = scalar_lea.sflag [#allocation4], %s3217_s11 }
  0x29   : > { %s3221_s29 = scalar_lea.vmem [#allocation3], %s2813_s19 }
  0x2a   : > { %3059 = dma.done.wait (%p3165_p4), %s214_s25, 96  }
  0x2b   : > { %3061 = vsyncadd (%p3165_p4), %s214_s25, 4294967200 }
  0x2c   : > { %3063 = dma.done.wait (%p3155_p1), [#allocation7], 16640  }
  0x2d   : > { %3065 = vsyncadd (%p3155_p1), [#allocation7], 4294950656  ;;  %v2221_v0 = vld [vmem:[#allocation6 + $0x70] sm:$0xf]  ;;  %v2697_v1 = vld [vmem:[#allocation6 + $0x74] sm:$0xf0] }
  0x2e   : > { %v2285_v2 = vld [vmem:[#allocation6 + $0xf0] sm:$0xf]  ;;  %v3231_v3 = vor.u32 %v2697_v1, %v2221_v0  ;;  %v2713_v4 = vld [vmem:[#allocation6 + $0xf4] sm:$0xf0]  ;;  %v2696_v5 = vld [vmem:[#allocation6 + $0x74] sm:$0xf] }
  0x2f   : > { %v2223_v6 = vld [vmem:[#allocation6 + $0x78] sm:$0xf0]  ;;  %v3233_v7 = vor.u32 %v2713_v4, %v2285_v2  ;;  %v2712_v9 = vld [vmem:[#allocation6 + $0xf4] sm:$0xf]  ;;  %v2213_v11 = vld [vmem:[#allocation6 + $0x60] sm:$0xf] }
  0x30   : > { %v3235_v8 = vor.u32 %v2696_v5, %v2223_v6  ;;  %v2287_v10 = vld [vmem:[#allocation6 + $0xf8] sm:$0xf0]  ;;  %560 = vmatpush.bf16.msra.mxu0 %v3231_v3  ;;  %v2695_v13 = vld [vmem:[#allocation6 + $0x64] sm:$0xf0]  ;;  %v2277_v14 = vld [vmem:[#allocation6 + $0xe0] sm:$0xf] }
  0x31   : > { %v3238_v12 = vor.u32 %v2712_v9, %v2287_v10  ;;  %v2711_v15 = vld [vmem:[#allocation6 + $0xe4] sm:$0xf0]  ;;  %573 = vmatpush.bf16.msra.mxu1 %v3233_v7  ;;  %v3242_v16 = vor.u32 %v2695_v13, %v2213_v11  ;;  %v2694_v18 = vld [vmem:[#allocation6 + $0x64] sm:$0xf]  ;;  %v2215_v19 = vld [vmem:[#allocation6 + $0x68] sm:$0xf0] }
  0x32   : > { %586 = vmatpush.bf16.msra.mxu2 %v3235_v8  ;;  %v3244_v17 = vor.u32 %v2711_v15, %v2277_v14  ;;  %v2710_v20 = vld [vmem:[#allocation6 + $0xe4] sm:$0xf]  ;;  %v3247_v21 = vor.u32 %v2694_v18, %v2215_v19  ;;  %v2279_v22 = vld [vmem:[#allocation6 + $0xe8] sm:$0xf0]  ;;  %v2205_v23 = vld [vmem:[#allocation6 + $0x50] sm:$0xf] }
  0x33   : > { %599 = vmatpush.bf16.msra.mxu3 %v3238_v12  ;;  %v2693_v24 = vld [vmem:[#allocation6 + $0x54] sm:$0xf0]  ;;  %v3249_v25 = vor.u32 %v2710_v20, %v2279_v22  ;;  %v2269_v26 = vld [vmem:[#allocation6 + $0xd0] sm:$0xf]  ;;  %v2692_v28 = vld [vmem:[#allocation6 + $0x54] sm:$0xf] }
  0x34   : > { %v2709_v27 = vld [vmem:[#allocation6 + $0xd4] sm:$0xf0]  ;;  %561 = vmatpush.bf16.msra.mxu0 %v3242_v16  ;;  %v3252_v29 = vor.u32 %v2693_v24, %v2205_v23  ;;  %v2207_v30 = vld [vmem:[#allocation6 + $0x58] sm:$0xf0]  ;;  %v2708_v31 = vld [vmem:[#allocation6 + $0xd4] sm:$0xf] }
  0x35   : > { %v2271_v32 = vld [vmem:[#allocation6 + $0xd8] sm:$0xf0]  ;;  %574 = vmatpush.bf16.msra.mxu1 %v3244_v17  ;;  %v3256_v33 = vor.u32 %v2709_v27, %v2269_v26  ;;  %v3258_v34 = vor.u32 %v2692_v28, %v2207_v30  ;;  %v2197_v35 = vld [vmem:[#allocation6 + $0x40] sm:$0xf]  ;;  %v2691_v36 = vld [vmem:[#allocation6 + $0x44] sm:$0xf0] }
  0x36   : > { %587 = vmatpush.bf16.msra.mxu2 %v3247_v21  ;;  %v2261_v37 = vld [vmem:[#allocation6 + $0xc0] sm:$0xf]  ;;  %v3261_v38 = vor.u32 %v2708_v31, %v2271_v32  ;;  %v2707_v39 = vld [vmem:[#allocation6 + $0xc4] sm:$0xf0]  ;;  %v2690_v40 = vld [vmem:[#allocation6 + $0x44] sm:$0xf]  ;;  %v3264_v44 = vor.u32 %v2691_v36, %v2197_v35 }
  0x37   : > { %4273 = vst [vmem:[#allocation13_spill] sm:$0xff] %v3256_v33  ;;  %600 = vmatpush.bf16.msra.mxu3 %v3249_v25  ;;  %v2199_v41 = vld [vmem:[#allocation6 + $0x48] sm:$0xf0]  ;;  %v2706_v42 = vld [vmem:[#allocation6 + $0xc4] sm:$0xf]  ;;  %v3268_v45 = vor.u32 %v2707_v39, %v2261_v37  ;;  %vm1354_vm6 = vcmask 1041408  }
  0x38   : > { %4274 = vst [vmem:[#allocation14_spill] sm:$0xff] %v3261_v38  ;;  %v2263_v43 = vld [vmem:[#allocation6 + $0xc8] sm:$0xf0]  ;;  %562 = vmatpush.bf16.msra.mxu0 %v3252_v29  ;;  %v3270_v46 = vor.u32 %v2690_v40, %v2199_v41  ;;  %v2189_v47 = vld [vmem:[#allocation6 + $0x30] sm:$0xf]  ;;  %s2162_s20 = sshll.u32 %s3217_s11, 2 }
  0x39   : > { %4275 = vst [vmem:[#allocation15_spill] sm:$0xff] %v3264_v44  ;;  %575 = vmatpush.bf16.msra.mxu1 %v3256_v33  ;;  %v2689_v48 = vld [vmem:[#allocation6 + $0x34] sm:$0xf0]  ;;  %v2253_v49 = vld [vmem:[#allocation6 + $0xb0] sm:$0xf]  ;;  %v3273_v50 = vor.u32 %v2706_v42, %v2263_v43  ;;  %s2810_s22 = sshll.u32 %s3084_s15, 2 }
  0x3a   : > { %588 = vmatpush.bf16.msra.mxu2 %v3258_v34  ;;  %4276 = vst [vmem:[#allocation16_spill] sm:$0xff] %v3268_v45  ;;  %v2705_v51 = vld [vmem:[#allocation6 + $0xb4] sm:$0xf0]  ;;  %v2688_v52 = vld [vmem:[#allocation6 + $0x34] sm:$0xf]  ;;  %v3276_v56 = vor.u32 %v2689_v48, %v2189_v47  ;;  %s2041_s28 = scalar_lea.hbm %s4087_s3, %s2810_s22  ;;  %s250_s30 = scalar_lea.vmem [#allocation9], %s2162_s20 }
  0x3b   : > { %4277 = vst [vmem:[#allocation17_spill] sm:$0xff] %v3270_v46  ;;  %601 = vmatpush.bf16.msra.mxu3 %v3261_v38  ;;  %v2191_v53 = vld [vmem:[#allocation6 + $0x38] sm:$0xf0]  ;;  %v2704_v54 = vld [vmem:[#allocation6 + $0xb4] sm:$0xf]  ;;  %v3280_v57 = vor.u32 %v2705_v51, %v2253_v49  ;;  %s2043_s4 = sshll.u32 %s250_s30, 4  ;;  %s2044_s4 = int_to_ptr.vmem [resolvable:$true] %s2043_s4 }
  0x3c   : > { %4278 = vst [vmem:[#allocation18_spill] sm:$0xff] %v3273_v50  ;;  %v2255_v55 = vld [vmem:[#allocation6 + $0xb8] sm:$0xf0]  ;;  %563 = vmatpush.bf16.msra.mxu0 %v3264_v44  ;;  %v3282_v58 = vor.u32 %v2688_v52, %v2191_v53  ;;  %v2181_v59 = vld [vmem:[#allocation6 + $0x20] sm:$0xf]  ;;  %s2045_s5 = sshll.u32 %s2041_s28, 4  ;;  %s2046_s5 = int_to_ptr.hbm [resolvable:$true] %s2045_s5 }
  0x3d   : > { %4279 = vst [vmem:[#allocation19_spill] sm:$0xff] %v3276_v56  ;;  %576 = vmatpush.bf16.msra.mxu1 %v3268_v45  ;;  %v2687_v60 = vld [vmem:[#allocation6 + $0x24] sm:$0xf0]  ;;  %v2245_v61 = vld [vmem:[#allocation6 + $0xa0] sm:$0xf]  ;;  %v3285_v62 = vor.u32 %v2704_v54, %v2255_v55  ;;  %s2028_s15 = scalar_lea.sflag [#allocation5], %s3217_s11 }
  0x3e   : > { %589 = vmatpush.bf16.msra.mxu2 %v3270_v46  ;;  %4280 = vst [vmem:[#allocation20_spill] sm:$0xff] %v3280_v57  ;;  %v2703_v63 = vld [vmem:[#allocation6 + $0xa4] sm:$0xf0]  ;;  %v2686_v0 = vld [vmem:[#allocation6 + $0x24] sm:$0xf]  ;;  %v3288_v5 = vor.u32 %v2687_v60, %v2181_v59  ;;  %s3020_s6 = sshra.s32 %s2046_s5, 4  ;;  %s3021_s6 = int_to_ptr.hbm [resolvable:$true] %s3020_s6 }
  0x3f   : > { %4281 = vst [vmem:[#allocation21_spill] sm:$0xff] %v3282_v58  ;;  %602 = vmatpush.bf16.msra.mxu3 %v3273_v50  ;;  %v2183_v1 = vld [vmem:[#allocation6 + $0x28] sm:$0xf0]  ;;  %v2702_v2 = vld [vmem:[#allocation6 + $0xa4] sm:$0xf]  ;;  %v3292_v9 = vor.u32 %v2703_v63, %v2245_v61  ;;  %s3022_s21 = scalar_lea.hbm %s3021_s6, 4  ;;  %p3027_p8 = scmp.lt.s32.totalorder %s3021_s6, %s4087_s3 }
  0x40   : > { %4282 = vst [vmem:[#allocation22_spill] sm:$0xff] %v3285_v62  ;;  %v2247_v4 = vld [vmem:[#allocation6 + $0xa8] sm:$0xf0]  ;;  %564 = vmatpush.bf16.msra.mxu0 %v3276_v56  ;;  %v2173_v6 = vld [vmem:[#allocation6 + $0x10] sm:$0xf]  ;;  %v3294_v10 = vor.u32 %v2686_v0, %v2183_v1  ;;  %p3023_p1 = scmp.ne.s32.totalorder %s3021_s6, %s3022_s21  ;;  %s3026_s9 = scalar_lea.hbm %s4087_s3, 8 }
  0x41   : > { %4283 = vst [vmem:[#allocation23_spill] sm:$0xff] %v3288_v5  ;;  %577 = vmatpush.bf16.msra.mxu1 %v3280_v57  ;;  %v2685_v11 = vld [vmem:[#allocation6 + $0x14] sm:$0xf0]  ;;  %v2237_v13 = vld [vmem:[#allocation6 + $0x90] sm:$0xf]  ;;  %v3297_v15 = vor.u32 %v2702_v2, %v2247_v4  ;;  %p3028_p12 = scmp.lt.s32.totalorder %s3026_s9, %s3022_s21 }
  0x42   : > { %590 = vmatpush.bf16.msra.mxu2 %v3282_v58  ;;  %4284 = vst [vmem:[#allocation24_spill] sm:$0xff] %v3292_v9  ;;  %v2701_v14 = vld [vmem:[#allocation6 + $0x94] sm:$0xf0]  ;;  %v2684_v18 = vld [vmem:[#allocation6 + $0x14] sm:$0xf]  ;;  %v3301_v24 = vor.u32 %v2685_v11, %v2173_v6  ;;  %p3024_p2 = pnand %p3023_p1, %p3200_p7 }
  0x43   : > { %4285 = vst [vmem:[#allocation25_spill] sm:$0xff] %v3294_v10  ;;  %603 = vmatpush.bf16.msra.mxu3 %v3285_v62  ;;  %v2175_v19 = vld [vmem:[#allocation6 + $0x18] sm:$0xf0]  ;;  %v390_v20 = vld [vmem:[%s3221_s29] sm:$0x3]  ;;  %v3305_v27 = vor.u32 %v2701_v14, %v2237_v13  ;;  %p3029_p13 = por %p3028_p12, %p3027_p8 }
  0x44   : > { %4286 = vst [vmem:[#allocation26_spill] sm:$0xff] %v3297_v15  ;;  %v2700_v22 = vld [vmem:[#allocation6 + $0x94] sm:$0xf]  ;;  %v2239_v23 = vld [vmem:[#allocation6 + $0x98] sm:$0xf0]  ;;  %565 = vmatpush.bf16.msra.mxu0 %v3288_v5  ;;  %v3307_v28 = vor.u32 %v2684_v18, %v2175_v19  ;;  %v391_v41 = vunpack.c.l.bf16 %v390_v20  ;;  %p3025_p4 = pneg %p3024_p2 }
  0x45   : > { %395 = vst [vmem:[#allocation1] ss:$9 sm:$0xff] %v390_v20  ;;  %v2165_v26 = vld [vmem:[#allocation6] sm:$0xf]  ;;  %578 = vmatpush.bf16.msra.mxu1 %v3292_v9  ;;  %v2683_v30 = vld [vmem:[#allocation6 + $0x4] sm:$0xf0]  ;;  %v3310_v35 = vor.u32 %v2700_v22, %v2239_v23 }
  0x46   : > { %4287 = vst [vmem:[#allocation27_spill] sm:$0xff] %v3301_v24  ;;  %591 = vmatpush.bf16.msra.mxu2 %v3294_v10  ;;  %v2229_v31 = vld [vmem:[#allocation6 + $0x80] sm:$0xf]  ;;  %v2699_v32 = vld [vmem:[#allocation6 + $0x84] sm:$0xf0]  ;;  %v3313_v47 = vor.u32 %v2683_v30, %v2165_v26  ;;  %p3030_p0 = pnand %p3029_p13, %p3025_p4 }
  0x47   : > { %4288 = vst [vmem:[#allocation28_spill] sm:$0xff] %v3305_v27  ;;  %604 = vmatpush.bf16.msra.mxu3 %v3297_v15  ;;  %v2682_v36 = vld [vmem:[#allocation6 + $0x4] sm:$0xf]  ;;  %v2167_v37 = vld [vmem:[#allocation6 + $0x8] sm:$0xf0]  ;;  %v3317_v51 = vor.u32 %v2699_v32, %v2229_v31 }
  0x48   : > { %4289 = vst [vmem:[#allocation29_spill] sm:$0xff] %v3307_v28  ;;  %v2698_v39 = vld [vmem:[#allocation6 + $0x84] sm:$0xf]  ;;  %v2231_v40 = vld [vmem:[#allocation6 + $0x88] sm:$0xf0]  ;;  %566 = vmatpush.bf16.msra.mxu0 %v3301_v24  ;;  %v3319_v52 = vor.u32 %v2682_v36, %v2167_v37 }
  0x49   : > { %4290 = vst [vmem:[#allocation30_spill] sm:$0xff] %v3310_v35  ;;  %v2349_v42 = vld [vmem:[#allocation6 + $0x170] sm:$0xf]  ;;  %v2729_v43 = vld [vmem:[#allocation6 + $0x174] sm:$0xf0]  ;;  %579 = vmatpush.bf16.msra.mxu1 %v3305_v27  ;;  %v3322_v59 = vor.u32 %v2698_v39, %v2231_v40 }
  0x4a   : > { %4291 = vst [vmem:[#allocation31_spill] sm:$0xff] %v3313_v47  ;;  %v2728_v48 = vld [vmem:[#allocation6 + $0x174] sm:$0xf]  ;;  %v2351_v49 = vld [vmem:[#allocation6 + $0x178] sm:$0xf0]  ;;  %592 = vmatpush.bf16.msra.mxu2 %v3307_v28  ;;  %v3324_v63 = vor.u32 %v2729_v43, %v2349_v42 }
  0x4b   : > { %4292 = vst [vmem:[#allocation32_spill] sm:$0xff] %v3317_v51  ;;  %v2341_v53 = vld [vmem:[#allocation6 + $0x160] sm:$0xf]  ;;  %v2727_v54 = vld [vmem:[#allocation6 + $0x164] sm:$0xf0]  ;;  %605 = vmatpush.bf16.msra.mxu3 %v3310_v35  ;;  %v3326_v1 = vor.u32 %v2728_v48, %v2351_v49 }
  0x4c   : > { %4293 = vst [vmem:[#allocation33_spill] sm:$0xff] %v3319_v52  ;;  %v2413_v55 = vld [vmem:[#allocation6 + $0x1f0] sm:$0xf]  ;;  %v396_v60 = vld [vmem:[#allocation1] sm:$0xff]  ;;  %v2745_v0 = vld [vmem:[#allocation6 + $0x1f4] sm:$0xf0]  ;;  %567 = vmatpush.bf16.msra.mxu0 %v3313_v47  ;;  %v3335_v14 = vor.u32 %v2727_v54, %v2341_v53 }
  0x4d   : > { %4294 = vst [vmem:[#allocation34_spill] sm:$0xff] %v3322_v59  ;;  %v397_v61 = vld [vmem:[#allocation1 + $0x9] sm:$0xff]  ;;  %v2415_v4 = vld [vmem:[#allocation6 + $0x1f8] sm:$0xf0]  ;;  %v2726_v6 = vld [vmem:[#allocation6 + $0x164] sm:$0xf]  ;;  %580 = vmatpush.bf16.msra.mxu1 %v3317_v51  ;;  %v3331_v13 = vor.u32 %v2745_v0, %v2413_v55 }
  0x4e   : > { %4295 = vst [vmem:[#allocation35_spill] sm:$0xff] %v3324_v63  ;;  %v2744_v2 = vld [vmem:[#allocation6 + $0x1f4] sm:$0xf]  ;;  %v2343_v11 = vld [vmem:[#allocation6 + $0x168] sm:$0xf0]  ;;  %593 = vmatpush.bf16.msra.mxu2 %v3319_v52 }
  0x4f   : > { %1049 = vst [vmem:[#allocation1] ss:$4 sm:$0xff] %v391_v41  ;;  %606 = vmatpush.bf16.msra.mxu3 %v3322_v59  ;;  %v3337_v18 = vor.u32 %v2744_v2, %v2415_v4  ;;  %v2333_v19 = vld [vmem:[#allocation6 + $0x150] sm:$0xf]  ;;  %v2405_v20 = vld [vmem:[#allocation6 + $0x1e0] sm:$0xf]  ;;  %568 = vmatmul.bf16.vlgmr.msra.gmra.mxu0 %v396_v60  ;;  %v3340_v23 = vor.u32 %v2726_v6, %v2343_v11 }
  0x50   : > { %4296 = vst [vmem:[#allocation36_spill] sm:$0xff] %v3326_v1  ;;  %778 = vmatpush.bf16.msrb.mxu0 %v3324_v63  ;;  %v2743_v22 = vld [vmem:[#allocation6 + $0x1e4] sm:$0xf0]  ;;  %v2725_v26 = vld [vmem:[#allocation6 + $0x154] sm:$0xf0]  ;;  %581 = vmatmul.bf16.vlgmr.msra.gmra.mxu1 %v397_v61 }
  0x51   : > { %4297 = vst [vmem:[#allocation37_spill] sm:$0xff] %v3331_v13  ;;  %v2742_v30 = vld [vmem:[#allocation6 + $0x1e4] sm:$0xf]  ;;  %v2407_v31 = vld [vmem:[#allocation6 + $0x1e8] sm:$0xf0]  ;;  %594 = vmatmul.bf16.vlgmr.msra.gmra.mxu2 %v396_v60  ;;  %791 = vmatpush.bf16.msrb.mxu1 %v3331_v13  ;;  %v3343_v37 = vor.u32 %v2743_v22, %v2405_v20  ;;  %v3347_v39 = vor.u32 %v2725_v26, %v2333_v19 }
  0x52   : > { %4298 = vst [vmem:[#allocation38_spill] sm:$0xff] %v3335_v14  ;;  %804 = vmatpush.bf16.msrb.mxu2 %v3326_v1  ;;  %v2724_v32 = vld [vmem:[#allocation6 + $0x154] sm:$0xf]  ;;  %v2335_v36 = vld [vmem:[#allocation6 + $0x158] sm:$0xf0]  ;;  %607 = vmatmul.bf16.vlgmr.msra.gmra.mxu3 %v397_v61  ;;  %v3349_v40 = vor.u32 %v2742_v30, %v2407_v31 }
  0x53   : > { %4299 = vst [vmem:[#allocation39_spill] sm:$0xff] %v3337_v18  ;;  %817 = vmatpush.bf16.msrb.mxu3 %v3337_v18  ;;  %v2325_v41 = vld [vmem:[#allocation6 + $0x140] sm:$0xf]  ;;  %v2397_v42 = vld [vmem:[#allocation6 + $0x1d0] sm:$0xf]  ;;  %v3352_v48 = vor.u32 %v2724_v32, %v2335_v36 }
  0x54   : > { %4300 = vst [vmem:[#allocation40_spill] sm:$0xff] %v3340_v23  ;;  %779 = vmatpush.bf16.msrb.mxu0 %v3335_v14  ;;  %v2741_v43 = vld [vmem:[#allocation6 + $0x1d4] sm:$0xf0]  ;;  %v2723_v49 = vld [vmem:[#allocation6 + $0x144] sm:$0xf0] }
  0x55   : > { %4301 = vst [vmem:[#allocation41_spill] sm:$0xff] %v3343_v37  ;;  %v2740_v53 = vld [vmem:[#allocation6 + $0x1d4] sm:$0xf]  ;;  %v2399_v54 = vld [vmem:[#allocation6 + $0x1d8] sm:$0xf0]  ;;  %792 = vmatpush.bf16.msrb.mxu1 %v3343_v37  ;;  %v3355_v61 = vor.u32 %v2741_v43, %v2397_v42  ;;  %v3359_v0 = vor.u32 %v2723_v49, %v2325_v41 }
  0x56   : > { %4302 = vst [vmem:[#allocation42_spill] sm:$0xff] %v3347_v39  ;;  %805 = vmatpush.bf16.msrb.mxu2 %v3340_v23  ;;  %v2722_v55 = vld [vmem:[#allocation6 + $0x144] sm:$0xf]  ;;  %v2327_v60 = vld [vmem:[#allocation6 + $0x148] sm:$0xf0]  ;;  %v3361_v2 = vor.u32 %v2740_v53, %v2399_v54 }
  0x57   : > { %4303 = vst [vmem:[#allocation43_spill] sm:$0xff] %v3349_v40  ;;  %818 = vmatpush.bf16.msrb.mxu3 %v3349_v40  ;;  %v2317_v4 = vld [vmem:[#allocation6 + $0x130] sm:$0xf]  ;;  %v2389_v6 = vld [vmem:[#allocation6 + $0x1c0] sm:$0xf]  ;;  %v3364_v19 = vor.u32 %v2722_v55, %v2327_v60 }
  0x58   : > { %4304 = vst [vmem:[#allocation44_spill] sm:$0xff] %v3352_v48  ;;  %780 = vmatpush.bf16.msrb.mxu0 %v3347_v39  ;;  %v2739_v11 = vld [vmem:[#allocation6 + $0x1c4] sm:$0xf0]  ;;  %v2721_v20 = vld [vmem:[#allocation6 + $0x134] sm:$0xf0] }
  0x59   : > { %4305 = vst [vmem:[#allocation45_spill] sm:$0xff] %v3355_v61  ;;  %v2738_v22 = vld [vmem:[#allocation6 + $0x1c4] sm:$0xf]  ;;  %v2391_v26 = vld [vmem:[#allocation6 + $0x1c8] sm:$0xf0]  ;;  %793 = vmatpush.bf16.msrb.mxu1 %v3355_v61  ;;  %v3367_v32 = vor.u32 %v2739_v11, %v2389_v6  ;;  %v3371_v36 = vor.u32 %v2721_v20, %v2317_v4 }
  0x5a   : > { %4306 = vst [vmem:[#allocation46_spill] sm:$0xff] %v3359_v0  ;;  %806 = vmatpush.bf16.msrb.mxu2 %v3352_v48  ;;  %v2720_v30 = vld [vmem:[#allocation6 + $0x134] sm:$0xf]  ;;  %v2319_v31 = vld [vmem:[#allocation6 + $0x138] sm:$0xf0]  ;;  %v3373_v41 = vor.u32 %v2738_v22, %v2391_v26 }
  0x5b   : > { %4307 = vst [vmem:[#allocation47_spill] sm:$0xff] %v3361_v2  ;;  %819 = vmatpush.bf16.msrb.mxu3 %v3361_v2  ;;  %v3376_v42 = vor.u32 %v2720_v30, %v2319_v31  ;;  %v2309_v43 = vld [vmem:[#allocation6 + $0x120] sm:$0xf]  ;;  %v2719_v49 = vld [vmem:[#allocation6 + $0x124] sm:$0xf0] }
  0x5c   : > { %4308 = vst [vmem:[#allocation48_spill] sm:$0xff] %v3364_v19  ;;  %781 = vmatpush.bf16.msrb.mxu0 %v3359_v0  ;;  %v2718_v53 = vld [vmem:[#allocation6 + $0x124] sm:$0xf]  ;;  %v2311_v54 = vld [vmem:[#allocation6 + $0x128] sm:$0xf0]  ;;  %v3381_v55 = vor.u32 %v2719_v49, %v2309_v43 }
  0x5d   : > { %4309 = vst [vmem:[#allocation49_spill] sm:$0xff] %v3367_v32  ;;  %794 = vmatpush.bf16.msrb.mxu1 %v3367_v32  ;;  %v3384_v60 = vor.u32 %v2718_v53, %v2311_v54  ;;  %v2381_v4 = vld [vmem:[#allocation6 + $0x1b0] sm:$0xf]  ;;  %v2737_v6 = vld [vmem:[#allocation6 + $0x1b4] sm:$0xf0] }
  0x5e   : > { %4310 = vst [vmem:[#allocation50_spill] sm:$0xff] %v3371_v36  ;;  %807 = vmatpush.bf16.msrb.mxu2 %v3364_v19  ;;  %v2736_v11 = vld [vmem:[#allocation6 + $0x1b4] sm:$0xf]  ;;  %v3388_v20 = vor.u32 %v2737_v6, %v2381_v4  ;;  %v2383_v22 = vld [vmem:[#allocation6 + $0x1b8] sm:$0xf0]  ;;  %v3450_v19 = vld [vmem:[#allocation8] sm:$0xff] }
  0x5f   : > { %4311 = vst [vmem:[#allocation51_spill] sm:$0xff] %v3373_v41  ;;  %820 = vmatpush.bf16.msrb.mxu3 %v3373_v41  ;;  %v3390_v26 = vor.u32 %v2736_v11, %v2383_v22  ;;  %v2301_v30 = vld [vmem:[#allocation6 + $0x110] sm:$0xf]  ;;  %v2717_v31 = vld [vmem:[#allocation6 + $0x114] sm:$0xf0] }
  0x60   : > { %4312 = vst [vmem:[#allocation52_spill] sm:$0xff] %v3376_v42  ;;  %782 = vmatpush.bf16.msrb.mxu0 %v3371_v36  ;;  %v3393_v43 = vor.u32 %v2717_v31, %v2301_v30  ;;  %v2716_v49 = vld [vmem:[#allocation6 + $0x114] sm:$0xf]  ;;  %v2303_v53 = vld [vmem:[#allocation6 + $0x118] sm:$0xf0] }
  0x61   : > { %4313 = vst [vmem:[#allocation53_spill] sm:$0xff] %v3381_v55  ;;  %795 = vmatpush.bf16.msrb.mxu1 %v3388_v20  ;;  %v3396_v54 = vor.u32 %v2716_v49, %v2303_v53  ;;  %v2734_v41 = vld [vmem:[#allocation6 + $0x1a4] sm:$0xf]  ;;  %v2375_v6 = vld [vmem:[#allocation6 + $0x1a8] sm:$0xf0] }
  0x62   : > { %808 = vmatpush.bf16.msrb.mxu2 %v3376_v42  ;;  %4314 = vst [vmem:[#allocation54_spill] sm:$0xff] %v3384_v60  ;;  %v3402_v11 = vor.u32 %v2734_v41, %v2375_v6  ;;  %v2293_v22 = vld [vmem:[#allocation6 + $0x100] sm:$0xf]  ;;  %v2715_v30 = vld [vmem:[#allocation6 + $0x104] sm:$0xf0] }
  0x63   : > { %4315 = vst [vmem:[#allocation55_spill] sm:$0xff] %v3388_v20  ;;  %821 = vmatpush.bf16.msrb.mxu3 %v3390_v26  ;;  %v2714_v31 = vld [vmem:[#allocation6 + $0x104] sm:$0xf]  ;;  %v2295_v49 = vld [vmem:[#allocation6 + $0x108] sm:$0xf0] }
  0x64   : > { %783 = vmatpush.bf16.msrb.mxu0 %v3381_v55  ;;  %4316 = vst [vmem:[#allocation56_spill] sm:$0xff] %v3390_v26  ;;  %v2735_v55 = vld [vmem:[#allocation6 + $0x1a4] sm:$0xf0]  ;;  %v3405_v26 = vor.u32 %v2715_v30, %v2293_v22  ;;  %v3408_v53 = vor.u32 %v2714_v31, %v2295_v49  ;;  %v2732_v41 = vld [vmem:[#allocation6 + $0x194] sm:$0xf] }
  0x65   : > { %4317 = vst [vmem:[#allocation57_spill] sm:$0xff] %v3393_v43  ;;  %v2367_v6 = vld [vmem:[#allocation6 + $0x198] sm:$0xf0]  ;;  %v2357_v22 = vld [vmem:[#allocation6 + $0x180] sm:$0xf] }
  0x66   : > { %809 = vmatpush.bf16.msrb.mxu2 %v3384_v60  ;;  %4318 = vst [vmem:[#allocation58_spill] sm:$0xff] %v3396_v54  ;;  %v2373_v60 = vld [vmem:[#allocation6 + $0x1a0] sm:$0xf]  ;;  %v2731_v30 = vld [vmem:[#allocation6 + $0x184] sm:$0xf0] }
  0x67   : > { %v3399_v4 = vor.u32 %v2735_v55, %v2373_v60  ;;  %4320 = vst [vmem:[#allocation60_spill] sm:$0xff] %v3402_v11  ;;  %822 = vmatpush.bf16.msrb.mxu3 %v3402_v11  ;;  %v2733_v55 = vld [vmem:[#allocation6 + $0x194] sm:$0xf0]  ;;  %v2730_v31 = vld [vmem:[#allocation6 + $0x184] sm:$0xf]  ;;  %v3418_v49 = vor.u32 %v2731_v30, %v2357_v22 }
  0x68   : > { %784 = vmatpush.bf16.msrb.mxu0 %v3393_v43  ;;  %4321 = vst [vmem:[#allocation61_spill] sm:$0xff] %v3405_v26  ;;  %v2365_v43 = vld [vmem:[#allocation6 + $0x190] sm:$0xf]  ;;  %v2359_v11 = vld [vmem:[#allocation6 + $0x188] sm:$0xf0] }
  0x69   : > { %4319 = vst [vmem:[#allocation59_spill] sm:$0xff] %v3399_v4  ;;  %796 = vmatpush.bf16.msrb.mxu1 %v3399_v4  ;;  %v3411_v60 = vor.u32 %v2733_v55, %v2365_v43  ;;  %v3420_v4 = vor.u32 %v2730_v31, %v2359_v11  ;;  %v2477_v43 = vld [vmem:[#allocation6 + $0x270] sm:$0xf]  ;;  %v2761_v55 = vld [vmem:[#allocation6 + $0x274] sm:$0xf0] }
  0x6a   : > { %810 = vmatpush.bf16.msrb.mxu2 %v3396_v54  ;;  %4322 = vst [vmem:[#allocation62_spill] sm:$0xff] %v3408_v53  ;;  %v3414_v54 = vor.u32 %v2732_v41, %v2367_v6  ;;  %v2760_v41 = vld [vmem:[#allocation6 + $0x274] sm:$0xf]  ;;  %v3424_v6 = vor.u32 %v2761_v55, %v2477_v43  ;;  %v2758_v20 = vld [vmem:[#allocation6 + $0x264] sm:$0xf] }
  0x6b   : > { %4323 = vst [vmem:[#allocation63_spill] sm:$0xff] %v3411_v60  ;;  %v2471_v22 = vld [vmem:[#allocation6 + $0x268] sm:$0xf0]  ;;  %v2541_v30 = vld [vmem:[#allocation6 + $0x2f0] sm:$0xf] }
  0x6c   : > { %785 = vmatpush.bf16.msrb.mxu0 %v3405_v26  ;;  %4324 = vst [vmem:[#allocation64_spill] sm:$0xff] %v3414_v54  ;;  %823 = vmatpush.bf16.msrb.mxu3 %v3414_v54  ;;  %v2759_v54 = vld [vmem:[#allocation6 + $0x264] sm:$0xf0]  ;;  %v2777_v31 = vld [vmem:[#allocation6 + $0x2f4] sm:$0xf0]  ;;  %v3432_v32 = vor.u32 %v2758_v20, %v2471_v22 }
  0x6d   : > { %797 = vmatpush.bf16.msrb.mxu1 %v3411_v60  ;;  %4325 = vst [vmem:[#allocation65_spill] sm:$0xff] %v3418_v49  ;;  %v2479_v60 = vld [vmem:[#allocation6 + $0x278] sm:$0xf0]  ;;  %v3434_v43 = vor.u32 %v2777_v31, %v2541_v30  ;;  %v2756_v42 = vld [vmem:[#allocation6 + $0x254] sm:$0xf] }
  0x6e   : > { %811 = vmatpush.bf16.msrb.mxu2 %v3408_v53  ;;  %4326 = vst [vmem:[#allocation66_spill] sm:$0xff] %v3420_v4  ;;  %v2469_v53 = vld [vmem:[#allocation6 + $0x260] sm:$0xf]  ;;  %v3426_v26 = vor.u32 %v2760_v41, %v2479_v60  ;;  %v2461_v60 = vld [vmem:[#allocation6 + $0x250] sm:$0xf] }
  0x6f   : > { %4327 = vst [vmem:[#allocation67_spill] sm:$0xff] %v3424_v6  ;;  %v3429_v11 = vor.u32 %v2759_v54, %v2469_v53  ;;  %v2757_v41 = vld [vmem:[#allocation6 + $0x254] sm:$0xf0]  ;;  %v2463_v36 = vld [vmem:[#allocation6 + $0x258] sm:$0xf0] }
  0x70   : > { %824 = vmatpush.bf16.msrb.mxu3 %v3420_v4  ;;  %4328 = vst [vmem:[#allocation68_spill] sm:$0xff] %v3426_v26  ;;  %996 = vmatpush.bf16.msra.mxu0 %v3424_v6  ;;  %v2543_v4 = vld [vmem:[#allocation6 + $0x2f8] sm:$0xf0]  ;;  %v2533_v2 = vld [vmem:[#allocation6 + $0x2e0] sm:$0xf]  ;;  %v3443_v20 = vor.u32 %v2757_v41, %v2461_v60  ;;  %v3448_v30 = vor.u32 %v2756_v42, %v2463_v36 }
  0x71   : > { %798 = vmatpush.bf16.msrb.mxu1 %v3418_v49  ;;  %4329 = vst [vmem:[#allocation69_spill] sm:$0xff] %v3429_v11  ;;  %v2776_v49 = vld [vmem:[#allocation6 + $0x2f4] sm:$0xf]  ;;  %v2775_v61 = vld [vmem:[#allocation6 + $0x2e4] sm:$0xf0] }
  0x72   : > { %1022 = vmatpush.bf16.msra.mxu2 %v3426_v26  ;;  %4330 = vst [vmem:[#allocation70_spill] sm:$0xff] %v3432_v32  ;;  %v3436_v55 = vor.u32 %v2776_v49, %v2543_v4  ;;  %v3440_v54 = vor.u32 %v2775_v61, %v2533_v2  ;;  %v2774_v53 = vld [vmem:[#allocation6 + $0x2e4] sm:$0xf]  ;;  %v2535_v26 = vld [vmem:[#allocation6 + $0x2e8] sm:$0xf0] }
  0x73   : > { %4331 = vst [vmem:[#allocation71_spill] sm:$0xff] %v3434_v43  ;;  %v3445_v4 = vor.u32 %v2774_v53, %v2535_v26  ;;  %v2453_v49 = vld [vmem:[#allocation6 + $0x240] sm:$0xf]  ;;  %v2755_v22 = vld [vmem:[#allocation6 + $0x244] sm:$0xf0] }
  0x74   : > { %4332 = vst [vmem:[#allocation72_spill] sm:$0xff] %v3436_v55  ;;  %1035 = vmatpush.bf16.msra.mxu3 %v3436_v55  ;;  %997 = vmatpush.bf16.msra.mxu0 %v3429_v11  ;;  %v2525_v31 = vld [vmem:[#allocation6 + $0x2d0] sm:$0xf]  ;;  %v2772_v6 = vld [vmem:[#allocation6 + $0x2d4] sm:$0xf]  ;;  %v3459_v36 = vor.u32 %v2755_v22, %v2453_v49 }
  0x75   : > { %1009 = vmatpush.bf16.msra.mxu1 %v3434_v43  ;;  %4333 = vst [vmem:[#allocation73_spill] sm:$0xff] %v3440_v54  ;;  %v2773_v43 = vld [vmem:[#allocation6 + $0x2d4] sm:$0xf0]  ;;  %v2754_v55 = vld [vmem:[#allocation6 + $0x244] sm:$0xf] }
  0x76   : > { %4334 = vst [vmem:[#allocation74_spill] sm:$0xff] %v3443_v20  ;;  %1023 = vmatpush.bf16.msra.mxu2 %v3432_v32  ;;  %v2455_v61 = vld [vmem:[#allocation6 + $0x248] sm:$0xf0]  ;;  %v2527_v2 = vld [vmem:[#allocation6 + $0x2d8] sm:$0xf0]  ;;  %v3454_v26 = vor.u32 %v2773_v43, %v2525_v31  ;;  %v3465_v32 = vperm.slane %v3450_v19, 0 }
  0x77   : > { %4335 = vst [vmem:[#allocation75_spill] sm:$0xff] %v3445_v4  ;;  %v3456_v60 = vor.u32 %v2772_v6, %v2527_v2  ;;  %v3462_v42 = vor.u32 %v2754_v55, %v2455_v61  ;;  %v2445_v41 = vld [vmem:[#allocation6 + $0x230] sm:$0xf]  ;;  %v2753_v53 = vld [vmem:[#allocation6 + $0x234] sm:$0xf0]  ;;  %v3476_v31 = vld [vmem:[#allocation8 + $0x8] sm:$0xff] }
  0x78   : > { %4336 = vst [vmem:[#allocation76_spill] sm:$0xff] %v3448_v30  ;;  %1036 = vmatpush.bf16.msra.mxu3 %v3445_v4  ;;  %998 = vmatpush.bf16.msra.mxu0 %v3443_v20  ;;  %v2447_v11 = vld [vmem:[#allocation6 + $0x238] sm:$0xf0]  ;;  %v3470_v6 = vor.u32 %v2753_v53, %v2445_v41  ;;  %v3480_v2 = vperm.slane %v3476_v31, 0  ;;  %v2771_v4 = vld [vmem:[#allocation6 + $0x2c4] sm:$0xf0] }
  0x79   : > { %1010 = vmatpush.bf16.msra.mxu1 %v3440_v54  ;;  %4337 = vst [vmem:[#allocation77_spill] sm:$0xff] %v3454_v26  ;;  %v2752_v54 = vld [vmem:[#allocation6 + $0x234] sm:$0xf]  ;;  %v2661_v20 = vld [vmem:[#allocation6 + $0x3e0] sm:$0xf] }
  0x7a   : > { %4338 = vst [vmem:[#allocation78_spill] sm:$0xff] %v3456_v60  ;;  %1024 = vmatpush.bf16.msra.mxu2 %v3448_v30  ;;  %v3473_v55 = vor.u32 %v2752_v54, %v2447_v11  ;;  %v2807_v0 = vld [vmem:[#allocation6 + $0x3e4] sm:$0xf0]  ;;  %v2663_v40 = vld [vmem:[#allocation6 + $0x3e8] sm:$0xf0] }
  0x7b   : > { %4339 = vst [vmem:[#allocation79_spill] sm:$0xff] %v3459_v36  ;;  %v2805_v37 = vld [vmem:[#allocation6 + $0x3d4] sm:$0xf0]  ;;  %v2804_v48 = vld [vmem:[#allocation6 + $0x3d4] sm:$0xf] }
  0x7c   : > { %4340 = vst [vmem:[#allocation80_spill] sm:$0xff] %v3462_v42  ;;  %1037 = vmatpush.bf16.msra.mxu3 %v3456_v60  ;;  %999 = vmatpush.bf16.msra.mxu0 %v3459_v36  ;;  %v2517_v36 = vld [vmem:[#allocation6 + $0x2c0] sm:$0xf]  ;;  %v2786_v39 = vld [vmem:[#allocation6 + $0x344] sm:$0xf] }
  0x7d   : > { %4341 = vst [vmem:[#allocation81_spill] sm:$0xff] %v3465_v32  ;;  %1011 = vmatpush.bf16.msra.mxu1 %v3454_v26  ;;  %v2573_v18 = vld [vmem:[#allocation6 + $0x330] sm:$0xf]  ;;  %v2785_v13 = vld [vmem:[#allocation6 + $0x334] sm:$0xf0] }
  0x7e   : > { %4342 = vst [vmem:[#allocation82_spill] sm:$0xff] %v3470_v6  ;;  %1025 = vmatpush.bf16.msra.mxu2 %v3462_v42  ;;  %v2784_v23 = vld [vmem:[#allocation6 + $0x334] sm:$0xf]  ;;  %v2575_v14 = vld [vmem:[#allocation6 + $0x338] sm:$0xf0] }
  0x7f   : > { %4343 = vst [vmem:[#allocation83_spill] sm:$0xff] %v3473_v55  ;;  %v2802_v51 = vld [vmem:[#allocation6 + $0x3c4] sm:$0xf]  ;;  %v2779_v52 = vld [vmem:[#allocation6 + $0x304] sm:$0xf0] }
  0x80   : > { %1000 = vmatpush.bf16.msra.mxu0 %v3470_v6  ;;  %4344 = vst [vmem:[#allocation84_spill] sm:$0xff] %v3480_v2  ;;  %v2621_v15 = vld [vmem:[#allocation6 + $0x390] sm:$0xf]  ;;  %v2797_v9 = vld [vmem:[#allocation6 + $0x394] sm:$0xf0] }
  0x81   : > { %v2623_v28 = vld [vmem:[#allocation6 + $0x398] sm:$0xf0] }
  0x82   : > { %1026 = vmatpush.bf16.msra.mxu2 %v3473_v55  ;;  %v2770_v55 = vld [vmem:[#allocation6 + $0x2c4] sm:$0xf] }
  0xcc   : > { %v569_v43 = vpop.f32.mrf.mxu0 }
  0xcd   : > { %v570_v49 = vadd.f32 %v569_v43, %v3465_v32  ;;  %v582_v22 = vpop.f32.mrf.mxu1 }
  0xcf   : > { %v583_v61 = vadd.f32 %v582_v22, %v570_v49 }
  0xd1   : > { %v612_v41 = vmax.f32 %v583_v61, 0.0  ;;  %v3484_v61 = vor.u32 %v2771_v4, %v2517_v36  ;;  %v2768_v4 = vld [vmem:[#allocation6 + $0x2b4] sm:$0xf]  ;;  %v2511_v36 = vld [vmem:[#allocation6 + $0x2b8] sm:$0xf0] }
  0xd3   : > { %v614_v53 = vpack.c.bf16 %v612_v41, %v612_v41  ;;  %4345 = vst [vmem:[#allocation85_spill] sm:$0xff] %v3484_v61  ;;  %v2519_v41 = vld [vmem:[#allocation6 + $0x2c8] sm:$0xf0]  ;;  %1012 = vmatpush.bf16.msra.mxu1 %v3484_v61  ;;  %v2591_v61 = vld [vmem:[#allocation6 + $0x358] sm:$0xf0] }
  0xd4   : > { %v595_v60 = vpop.f32.mrf.mxu2  ;;  %v571_v54 = vpop.f32.mrf.mxu0  ;;  %v3486_v30 = vor.u32 %v2770_v55, %v2519_v41  ;;  %v3497_v55 = vor.u32 %v2768_v4, %v2511_v36  ;;  %v2748_v41 = vld [vmem:[#allocation6 + $0x214] sm:$0xf]  ;;  %v2503_v36 = vld [vmem:[#allocation6 + $0x2a8] sm:$0xf0] }
  0xd5   : > { %v596_v26 = vadd.f32 %v595_v60, %v3480_v2  ;;  %v608_v11 = vpop.f32.mrf.mxu3  ;;  %v584_v42 = vpop.f32.mrf.mxu1  ;;  %786 = vmatmul.bf16.vlgmr.msrb.gmra.mxu0 %v614_v53  ;;  %812 = vmatmul.bf16.vlgmr.msrb.gmra.mxu2 %v614_v53  ;;  %v2437_v60 = vld [vmem:[#allocation6 + $0x220] sm:$0xf]  ;;  %v2751_v54 = vld [vmem:[#allocation6 + $0x224] sm:$0xf0]  ;;  %v2509_v53 = vld [vmem:[#allocation6 + $0x2b0] sm:$0xf] }
  0xd6   : > { %4346 = vst [vmem:[#allocation86_spill] sm:$0xff] %v3486_v30  ;;  %v2750_v42 = vld [vmem:[#allocation6 + $0x224] sm:$0xf]  ;;  %1038 = vmatpush.bf16.msra.mxu3 %v3486_v30  ;;  %v2788_v30 = vld [vmem:[#allocation6 + $0x354] sm:$0xf] }
  0xd7   : > { %v609_v43 = vadd.f32 %v608_v11, %v596_v26  ;;  %v3489_v26 = vor.u32 %v2751_v54, %v2437_v60  ;;  %4350 = vst [vmem:[#allocation90_spill] sm:$0xff] %v3497_v55  ;;  %v2431_v54 = vld [vmem:[#allocation6 + $0x218] sm:$0xf0] }
  0xd9   : > { %v613_v32 = vmax.f32 %v609_v43, 0.0  ;;  %4347 = vst [vmem:[#allocation87_spill] sm:$0xff] %v3489_v26  ;;  %1001 = vmatpush.bf16.msra.mxu0 %v3489_v26 }
  0xda   : > { %1039 = vmatpush.bf16.msra.mxu3 %v3497_v55 }
  0xdb   : > { %v615_v49 = vpack.c.bf16 %v613_v32, %v613_v32  ;;  %v2439_v32 = vld [vmem:[#allocation6 + $0x228] sm:$0xf0] }
  0xdc   : > { %v597_v22 = vpop.f32.mrf.mxu2  ;;  %v3492_v11 = vor.u32 %v2750_v42, %v2439_v32  ;;  %v3504_v42 = vor.u32 %v2748_v41, %v2431_v54  ;;  %v2501_v32 = vld [vmem:[#allocation6 + $0x2a0] sm:$0xf]  ;;  %v2423_v41 = vld [vmem:[#allocation6 + $0x208] sm:$0xf0] }
  0xdd   : > { %v610_v6 = vpop.f32.mrf.mxu3  ;;  %799 = vmatmul.bf16.vlgmr.msrb.gmra.mxu1 %v615_v49  ;;  %825 = vmatmul.bf16.vlgmr.msrb.gmra.mxu3 %v615_v49  ;;  %v2429_v49 = vld [vmem:[#allocation6 + $0x210] sm:$0xf]  ;;  %v2749_v22 = vld [vmem:[#allocation6 + $0x214] sm:$0xf0] }
  0xde   : > { %v2769_v6 = vld [vmem:[#allocation6 + $0x2b4] sm:$0xf0]  ;;  %4348 = vst [vmem:[#allocation88_spill] sm:$0xff] %v3492_v11  ;;  %1027 = vmatpush.bf16.msra.mxu2 %v3492_v11  ;;  %v3501_v60 = vor.u32 %v2749_v22, %v2429_v49  ;;  %v2747_v49 = vld [vmem:[#allocation6 + $0x204] sm:$0xf0] }
  0xdf   : > { %v3494_v43 = vor.u32 %v2769_v6, %v2509_v53  ;;  %4352 = vst [vmem:[#allocation92_spill] sm:$0xff] %v3504_v42  ;;  %v2767_v53 = vld [vmem:[#allocation6 + $0x2a4] sm:$0xf0]  ;;  %v2766_v6 = vld [vmem:[#allocation6 + $0x2a4] sm:$0xf] }
  0xe0   : > { %4351 = vst [vmem:[#allocation91_spill] sm:$0xff] %v3501_v60  ;;  %1002 = vmatpush.bf16.msra.mxu0 %v3501_v60  ;;  %v3507_v4 = vor.u32 %v2767_v53, %v2501_v32  ;;  %v3510_v2 = vor.u32 %v2766_v6, %v2503_v36  ;;  %v2746_v22 = vld [vmem:[#allocation6 + $0x204] sm:$0xf]  ;;  %v2493_v60 = vld [vmem:[#allocation6 + $0x290] sm:$0xf] }
  0xe1   : > { %4349 = vst [vmem:[#allocation89_spill] sm:$0xff] %v3494_v43  ;;  %1013 = vmatpush.bf16.msra.mxu1 %v3494_v43  ;;  %v2421_v43 = vld [vmem:[#allocation6 + $0x200] sm:$0xf]  ;;  %v3516_v54 = vor.u32 %v2746_v22, %v2423_v41  ;;  %v2765_v32 = vld [vmem:[#allocation6 + $0x294] sm:$0xf0] }
  0xe2   : > { %4353 = vst [vmem:[#allocation93_spill] sm:$0xff] %v3507_v4  ;;  %1028 = vmatpush.bf16.msra.mxu2 %v3504_v42  ;;  %v3513_v55 = vor.u32 %v2747_v49, %v2421_v43  ;;  %1040 = vmatpush.bf16.msra.mxu3 %v3510_v2  ;;  %v3519_v53 = vor.u32 %v2765_v32, %v2493_v60  ;;  %v2764_v6 = vld [vmem:[#allocation6 + $0x294] sm:$0xf]  ;;  %v2495_v36 = vld [vmem:[#allocation6 + $0x298] sm:$0xf0] }
  0xe3   : > { %4354 = vst [vmem:[#allocation94_spill] sm:$0xff] %v3510_v2  ;;  %v3522_v42 = vor.u32 %v2764_v6, %v2495_v36  ;;  %v2485_v43 = vld [vmem:[#allocation6 + $0x280] sm:$0xf]  ;;  %v2763_v49 = vld [vmem:[#allocation6 + $0x284] sm:$0xf0] }
  0xe4   : > { %4355 = vst [vmem:[#allocation95_spill] sm:$0xff] %v3513_v55  ;;  %1003 = vmatpush.bf16.msra.mxu0 %v3513_v55  ;;  %v2762_v22 = vld [vmem:[#allocation6 + $0x284] sm:$0xf]  ;;  %v3526_v41 = vor.u32 %v2763_v49, %v2485_v43  ;;  %v2487_v2 = vld [vmem:[#allocation6 + $0x288] sm:$0xf0] }
  0xe5   : > { %1014 = vmatpush.bf16.msra.mxu1 %v3507_v4  ;;  %4356 = vst [vmem:[#allocation96_spill] sm:$0xff] %v3516_v54  ;;  %v3528_v4 = vor.u32 %v2762_v22, %v2487_v2  ;;  %v2605_v60 = vld [vmem:[#allocation6 + $0x370] sm:$0xf]  ;;  %v2793_v32 = vld [vmem:[#allocation6 + $0x374] sm:$0xf0] }
  0xe6   : > { %4357 = vst [vmem:[#allocation97_spill] sm:$0xff] %v3519_v53  ;;  %1029 = vmatpush.bf16.msra.mxu2 %v3516_v54  ;;  %1041 = vmatpush.bf16.msra.mxu3 %v3522_v42  ;;  %v2792_v6 = vld [vmem:[#allocation6 + $0x374] sm:$0xf]  ;;  %v3532_v36 = vor.u32 %v2793_v32, %v2605_v60  ;;  %v2597_v54 = vld [vmem:[#allocation6 + $0x360] sm:$0xf] }
  0xe7   : > { %4358 = vst [vmem:[#allocation98_spill] sm:$0xff] %v3522_v42  ;;  %v2791_v42 = vld [vmem:[#allocation6 + $0x364] sm:$0xf0]  ;;  %v2790_v11 = vld [vmem:[#allocation6 + $0x364] sm:$0xf] }
  0xe8   : > { %4359 = vst [vmem:[#allocation99_spill] sm:$0xff] %v3526_v41  ;;  %v2599_v43 = vld [vmem:[#allocation6 + $0x368] sm:$0xf0]  ;;  %v2669_v49 = vld [vmem:[#allocation6 + $0x3f0] sm:$0xf]  ;;  %1218 = vmatpush.bf16.msrb.mxu0 %v3532_v36  ;;  %v3537_v2 = vor.u32 %v2791_v42, %v2597_v54  ;;  %v3548_v42 = vor.u32 %v2807_v0, %v2661_v20 }
  0xe9   : > { %1015 = vmatpush.bf16.msra.mxu1 %v3519_v53  ;;  %4360 = vst [vmem:[#allocation100_spill] sm:$0xff] %v3528_v4  ;;  %v2607_v53 = vld [vmem:[#allocation6 + $0x378] sm:$0xf0]  ;;  %v2809_v22 = vld [vmem:[#allocation6 + $0x3f4] sm:$0xf0]  ;;  %v3540_v26 = vor.u32 %v2790_v11, %v2599_v43 }
  0xea   : > { %1042 = vmatpush.bf16.msra.mxu3 %v3528_v4  ;;  %v3534_v55 = vor.u32 %v2792_v6, %v2607_v53  ;;  %v2671_v4 = vld [vmem:[#allocation6 + $0x3f8] sm:$0xf0]  ;;  %v3542_v60 = vor.u32 %v2809_v22, %v2669_v49  ;;  %v2589_v53 = vld [vmem:[#allocation6 + $0x350] sm:$0xf]  ;;  %v2789_v6 = vld [vmem:[#allocation6 + $0x354] sm:$0xf0]  ;;  %v3556_v49 = vor.u32 %v2788_v30, %v2591_v61 }
  0xeb   : > { %v2806_v54 = vld [vmem:[#allocation6 + $0x3e4] sm:$0xf]  ;;  %v3551_v11 = vor.u32 %v2789_v6, %v2589_v53  ;;  %v2787_v43 = vld [vmem:[#allocation6 + $0x344] sm:$0xf0]  ;;  %v2653_v22 = vld [vmem:[#allocation6 + $0x3d0] sm:$0xf] }
  0xec   : > { %1244 = vmatpush.bf16.msrb.mxu2 %v3534_v55  ;;  %1219 = vmatpush.bf16.msrb.mxu0 %v3537_v2  ;;  %v2583_v0 = vld [vmem:[#allocation6 + $0x348] sm:$0xf0]  ;;  %v2655_v20 = vld [vmem:[#allocation6 + $0x3d8] sm:$0xf0]  ;;  %v3560_v53 = vor.u32 %v2805_v37, %v2653_v22  ;;  %v3565_v6 = vperm.slane %v3450_v19, 1 }
  0xed   : > { %1016 = vmatpush.bf16.msra.mxu1 %v3526_v41  ;;  %v2808_v41 = vld [vmem:[#allocation6 + $0x3f4] sm:$0xf]  ;;  %v3571_v61 = vor.u32 %v2786_v39, %v2583_v0  ;;  %v3583_v39 = vperm.slane %v3476_v31, 1 }
  0xee   : > { %v3544_v32 = vor.u32 %v2808_v41, %v2671_v4  ;;  %v3553_v4 = vor.u32 %v2806_v54, %v2663_v40  ;;  %v2581_v41 = vld [vmem:[#allocation6 + $0x340] sm:$0xf]  ;;  %v3562_v40 = vor.u32 %v2804_v48, %v2655_v20  ;;  %4361 = vst [vmem:[#allocation101_spill] sm:$0xff] %v3565_v6  ;;  %v3577_v48 = vor.u32 %v2785_v13, %v2573_v18 }
  0xef   : > { %v3568_v30 = vor.u32 %v2787_v43, %v2581_v41  ;;  %v3580_v41 = vor.u32 %v2784_v23, %v2575_v14  ;;  %4362 = vst [vmem:[#allocation102_spill] sm:$0xff] %v3583_v39 }
  0xf0   : > { %1257 = vmatpush.bf16.msrb.mxu3 %v3544_v32  ;;  %1245 = vmatpush.bf16.msrb.mxu2 %v3540_v26 }
  0xf1   : > { %1231 = vmatpush.bf16.msrb.mxu1 %v3542_v60  ;;  %1220 = vmatpush.bf16.msrb.mxu0 %v3551_v11 }
  0xf4   : > { %1258 = vmatpush.bf16.msrb.mxu3 %v3553_v4  ;;  %1246 = vmatpush.bf16.msrb.mxu2 %v3556_v49 }
  0xf5   : > { %1232 = vmatpush.bf16.msrb.mxu1 %v3548_v42  ;;  %1221 = vmatpush.bf16.msrb.mxu0 %v3568_v30 }
  0xf8   : > { %1259 = vmatpush.bf16.msrb.mxu3 %v3562_v40  ;;  %1247 = vmatpush.bf16.msrb.mxu2 %v3571_v61 }
  0xf9   : > { %1233 = vmatpush.bf16.msrb.mxu1 %v3560_v53  ;;  %1222 = vmatpush.bf16.msrb.mxu0 %v3577_v48 }
  0xfc   : > { %1248 = vmatpush.bf16.msrb.mxu2 %v3580_v41 }
 0x152   : > { %v787_v54 = vpop.f32.mrf.mxu0 }
 0x153   : > { %v788_v37 = vadd.f32 %v787_v54, %v3565_v6 }
 0x158   : > { %v813_v43 = vpop.f32.mrf.mxu2 }
 0x159   : > { %v814_v6 = vadd.f32 %v813_v43, %v3583_v39  ;;  %v2565_v43 = vld [vmem:[#allocation6 + $0x320] sm:$0xf] }
 0x15a   : > { %v800_v22 = vpop.f32.mrf.mxu1  ;;  %v789_v20 = vpop.f32.mrf.mxu0  ;;  %v2549_v39 = vld [vmem:[#allocation6 + $0x300] sm:$0xf] }
 0x15b   : > { %v801_v0 = vadd.f32 %v800_v22, %v788_v37  ;;  %v2645_v22 = vld [vmem:[#allocation6 + $0x3c0] sm:$0xf]  ;;  %v2803_v20 = vld [vmem:[#allocation6 + $0x3c4] sm:$0xf0] }
 0x15c   : > { %v3588_v35 = vor.u32 %v2803_v20, %v2645_v22  ;;  %v2557_v22 = vld [vmem:[#allocation6 + $0x310] sm:$0xf]  ;;  %v2781_v20 = vld [vmem:[#allocation6 + $0x314] sm:$0xf0] }
 0x15d   : > { %v830_v54 = vmax.f32 %v801_v0, 0.0  ;;  %v2647_v0 = vld [vmem:[#allocation6 + $0x3c8] sm:$0xf0] }
 0x15e   : > { %4363 = vst [vmem:[#allocation103_spill] sm:$0xff] %v3588_v35  ;;  %v3590_v27 = vor.u32 %v2802_v51, %v2647_v0  ;;  %1234 = vmatpush.bf16.msrb.mxu1 %v3588_v35  ;;  %v2780_v0 = vld [vmem:[#allocation6 + $0x314] sm:$0xf] }
 0x15f   : > { %v832_v13 = vpack.c.bf16 %v830_v54, %v830_v54  ;;  %v2783_v54 = vld [vmem:[#allocation6 + $0x324] sm:$0xf0] }
 0x160   : > { %v826_v18 = vpop.f32.mrf.mxu3  ;;  %v815_v14 = vpop.f32.mrf.mxu2  ;;  %4364 = vst [vmem:[#allocation104_spill] sm:$0xff] %v3590_v27  ;;  %1260 = vmatpush.bf16.msrb.mxu3 %v3590_v27 }
 0x161   : > { %v827_v1 = vadd.f32 %v826_v18, %v814_v6  ;;  %1004 = vmatmul.bf16.vlgmr.msra.gmra.mxu0 %v832_v13  ;;  %1030 = vmatmul.bf16.vlgmr.msra.gmra.mxu2 %v832_v13  ;;  %v2782_v6 = vld [vmem:[#allocation6 + $0x324] sm:$0xf]  ;;  %v3593_v13 = vor.u32 %v2783_v54, %v2565_v43  ;;  %v2801_v18 = vld [vmem:[#allocation6 + $0x3b4] sm:$0xf0]  ;;  %v3605_v43 = vor.u32 %v2781_v20, %v2557_v22  ;;  %v2559_v54 = vld [vmem:[#allocation6 + $0x318] sm:$0xf0] }
 0x162   : > { %v802_v23 = vpop.f32.mrf.mxu1  ;;  %v3617_v20 = vor.u32 %v2779_v52, %v2549_v39  ;;  %v2613_v52 = vld [vmem:[#allocation6 + $0x380] sm:$0xf]  ;;  %v2795_v39 = vld [vmem:[#allocation6 + $0x384] sm:$0xf0] }
 0x163   : > { %v831_v63 = vmax.f32 %v827_v1, 0.0  ;;  %4365 = vst [vmem:[#allocation105_spill] sm:$0xff] %v3593_v13  ;;  %v2567_v1 = vld [vmem:[#allocation6 + $0x328] sm:$0xf0]  ;;  %v2800_v23 = vld [vmem:[#allocation6 + $0x3b4] sm:$0xf]  ;;  %1223 = vmatpush.bf16.msrb.mxu0 %v3593_v13 }
 0x165   : > { %v833_v59 = vpack.c.bf16 %v831_v63, %v831_v63  ;;  %v2637_v63 = vld [vmem:[#allocation6 + $0x3b0] sm:$0xf] }
 0x166   : > { %v3598_v14 = vor.u32 %v2801_v18, %v2637_v63  ;;  %v2799_v63 = vld [vmem:[#allocation6 + $0x3a4] sm:$0xf0] }
 0x167   : > { %1017 = vmatmul.bf16.vlgmr.msra.gmra.mxu1 %v833_v59  ;;  %1043 = vmatmul.bf16.vlgmr.msra.gmra.mxu3 %v833_v59  ;;  %v3596_v59 = vor.u32 %v2782_v6, %v2567_v1  ;;  %v3608_v6 = vor.u32 %v2780_v0, %v2559_v54  ;;  %v2629_v1 = vld [vmem:[#allocation6 + $0x3a0] sm:$0xf]  ;;  %v2778_v0 = vld [vmem:[#allocation6 + $0x304] sm:$0xf]  ;;  %v2551_v54 = vld [vmem:[#allocation6 + $0x308] sm:$0xf0] }
 0x168   : > { %v828_v37 = vpop.f32.mrf.mxu3  ;;  %1235 = vmatpush.bf16.msrb.mxu1 %v3598_v14  ;;  %1224 = vmatpush.bf16.msrb.mxu0 %v3605_v43  ;;  %v3611_v18 = vor.u32 %v2799_v63, %v2629_v1  ;;  %v3619_v47 = vor.u32 %v2778_v0, %v2551_v54  ;;  %v2796_v1 = vld [vmem:[#allocation6 + $0x394] sm:$0xf]  ;;  %v3623_v63 = vor.u32 %v2797_v9, %v2621_v15  ;;  %v2615_v9 = vld [vmem:[#allocation6 + $0x388] sm:$0xf0] }
 0x169   : > { %v2639_v37 = vld [vmem:[#allocation6 + $0x3b8] sm:$0xf0]  ;;  %1249 = vmatpush.bf16.msrb.mxu2 %v3596_v59  ;;  %4367 = vst [vmem:[#allocation107_spill] sm:$0xff] %v3608_v6  ;;  %v3632_v0 = vor.u32 %v2795_v39, %v2613_v52  ;;  %v1050_v15 = vld.sshfl [vmem:[#allocation1] sm:$0xff pattern:$0x73625140] }
 0x16a   : > { %v3601_v51 = vor.u32 %v2800_v23, %v2639_v37  ;;  %v2798_v23 = vld [vmem:[#allocation6 + $0x3a4] sm:$0xf]  ;;  %v2631_v37 = vld [vmem:[#allocation6 + $0x3a8] sm:$0xf0]  ;;  %v3660_v39 = vperm.slane %v3450_v19, 2  ;;  %v3670_v19 = vperm.slane %v3476_v31, 2 }
 0x16b   : > { %v3615_v22 = vor.u32 %v2798_v23, %v2631_v37  ;;  %v3626_v23 = vor.u32 %v2796_v1, %v2623_v28  ;;  %v2794_v37 = vld [vmem:[#allocation6 + $0x384] sm:$0xf]  ;;  %v1051_v28 = vld.sshfl [vmem:[#allocation1 + $0x8] sm:$0xff pattern:$0x73625140] }
 0x16c   : > { %4366 = vst [vmem:[#allocation106_spill] sm:$0xff] %v3601_v51  ;;  %1261 = vmatpush.bf16.msrb.mxu3 %v3601_v51  ;;  %1236 = vmatpush.bf16.msrb.mxu1 %v3611_v18  ;;  %v3634_v54 = vor.u32 %v2794_v37, %v2615_v9  ;;  %v3638_v1 = vld [vmem:[%s3221_s29 + $0x2] sm:$0x3] }
 0x16d   : > { %1250 = vmatpush.bf16.msrb.mxu2 %v3608_v6  ;;  %1225 = vmatpush.bf16.msrb.mxu0 %v3617_v20  ;;  %1363 = vst [vmem:[#allocation1] ss:$9 sm:$0xff] %v3638_v1 }
 0x16e   : > { %4368 = vst [vmem:[#allocation108_spill] sm:$0xff] %v3660_v39 }
 0x170   : > { %1262 = vmatpush.bf16.msrb.mxu3 %v3615_v22  ;;  %1237 = vmatpush.bf16.msrb.mxu1 %v3623_v63 }
 0x171   : > { %1251 = vmatpush.bf16.msrb.mxu2 %v3619_v47  ;;  %1276 = vmatpush.bf16.msra.mxu0 %v3532_v36 }
 0x174   : > { %1263 = vmatpush.bf16.msrb.mxu3 %v3626_v23  ;;  %1238 = vmatpush.bf16.msrb.mxu1 %v3632_v0 }
 0x175   : > { %1302 = vmatpush.bf16.msra.mxu2 %v3534_v55  ;;  %1277 = vmatpush.bf16.msra.mxu0 %v3537_v2 }
 0x178   : > { %1289 = vmatpush.bf16.msra.mxu1 %v3542_v60  ;;  %1264 = vmatpush.bf16.msrb.mxu3 %v3634_v54 }
 0x179   : > { %1303 = vmatpush.bf16.msra.mxu2 %v3540_v26  ;;  %1278 = vmatpush.bf16.msra.mxu0 %v3551_v11 }
 0x17c   : > { %1315 = vmatpush.bf16.msra.mxu3 %v3544_v32  ;;  %1290 = vmatpush.bf16.msra.mxu1 %v3548_v42 }
 0x17d   : > { %1304 = vmatpush.bf16.msra.mxu2 %v3556_v49  ;;  %1279 = vmatpush.bf16.msra.mxu0 %v3568_v30 }
 0x180   : > { %1316 = vmatpush.bf16.msra.mxu3 %v3553_v4  ;;  %1291 = vmatpush.bf16.msra.mxu1 %v3560_v53 }
 0x181   : > { %1305 = vmatpush.bf16.msra.mxu2 %v3571_v61  ;;  %1280 = vmatpush.bf16.msra.mxu0 %v3577_v48 }
 0x184   : > { %1317 = vmatpush.bf16.msra.mxu3 %v3562_v40  ;;  %1292 = vmatpush.bf16.msra.mxu1 %v3588_v35 }
 0x185   : > { %1306 = vmatpush.bf16.msra.mxu2 %v3580_v41  ;;  %1281 = vmatpush.bf16.msra.mxu0 %v3593_v13 }
 0x188   : > { %1318 = vmatpush.bf16.msra.mxu3 %v3590_v27  ;;  %1293 = vmatpush.bf16.msra.mxu1 %v3598_v14 }
 0x189   : > { %1307 = vmatpush.bf16.msra.mxu2 %v3596_v59  ;;  %1282 = vmatpush.bf16.msra.mxu0 %v3605_v43 }
 0x18c   : > { %1319 = vmatpush.bf16.msra.mxu3 %v3601_v51  ;;  %1294 = vmatpush.bf16.msra.mxu1 %v3611_v18 }
 0x18d   : > { %1308 = vmatpush.bf16.msra.mxu2 %v3608_v6  ;;  %1283 = vmatpush.bf16.msra.mxu0 %v3617_v20 }
 0x190   : > { %1320 = vmatpush.bf16.msra.mxu3 %v3615_v22  ;;  %1295 = vmatpush.bf16.msra.mxu1 %v3623_v63 }
 0x191   : > { %1309 = vmatpush.bf16.msra.mxu2 %v3619_v47 }
 0x194   : > { %1321 = vmatpush.bf16.msra.mxu3 %v3626_v23  ;;  %1296 = vmatpush.bf16.msra.mxu1 %v3632_v0 }
 0x198   : > { %1322 = vmatpush.bf16.msra.mxu3 %v3634_v54 }
 0x1de   : > { %v1005_v52 = vpop.f32.mrf.mxu0 }
 0x1df   : > { %v1006_v37 = vadd.f32 %v1005_v52, %v3660_v39 }
 0x1e4   : > { %v1018_v9 = vpop.f32.mrf.mxu1  ;;  %v1031_v35 = vpop.f32.mrf.mxu2 }
 0x1e5   : > { %v1019_v13 = vadd.f32 %v1018_v9, %v1006_v37  ;;  %v1032_v39 = vadd.f32 %v1031_v35, %v3670_v19  ;;  %v4372_v9 = vld [vmem:[#allocation31_spill] sm:$0xff] }
 0x1e6   : > { %v1007_v27 = vpop.f32.mrf.mxu0 }
 0x1e7   : > { %v1054_v51 = vadd.f32 %v1050_v15, %v1019_v13 }
 0x1e9   : > { %v1056_v52 = vpack.c.bf16 %v1054_v51, %v1054_v51 }
 0x1ea   : > { %v1044_v6 = vpop.f32.mrf.mxu3 }
 0x1eb   : > { %v1045_v37 = vadd.f32 %v1044_v6, %v1032_v39  ;;  %1226 = vmatmul.bf16.vlgmr.msrb.gmra.mxu0 %v1056_v52  ;;  %1252 = vmatmul.bf16.vlgmr.msrb.gmra.mxu2 %v1056_v52  ;;  %v4369_v6 = vld [vmem:[#allocation29_spill] sm:$0xff]  ;;  %v4371_v39 = vld [vmem:[#allocation26_spill] sm:$0xff] }
 0x1ec   : > { %v1020_v31 = vpop.f32.mrf.mxu1  ;;  %v1033_v27 = vpop.f32.mrf.mxu2  ;;  %1368 = vmatpush.bf16.msrb.mxu0 %v3231_v3  ;;  %1394 = vmatpush.bf16.msrb.mxu2 %v3235_v8  ;;  %v4373_v52 = vld [vmem:[#allocation33_spill] sm:$0xff] }
 0x1ed   : > { %v1055_v13 = vadd.f32 %v1051_v28, %v1045_v37  ;;  %v4370_v28 = vld [vmem:[#allocation24_spill] sm:$0xff]  ;;  %v4375_v31 = vld [vmem:[#allocation30_spill] sm:$0xff] }
 0x1ee   : > { %v4374_v37 = vld [vmem:[#allocation28_spill] sm:$0xff] }
 0x1ef   : > { %v1057_v15 = vpack.c.bf16 %v1055_v13, %v1055_v13  ;;  %v4376_v27 = vld [vmem:[#allocation32_spill] sm:$0xff] }
 0x1f0   : > { %1369 = vmatpush.bf16.msrb.mxu0 %v3242_v16  ;;  %1395 = vmatpush.bf16.msrb.mxu2 %v3247_v21 }
 0x1f1   : > { %1239 = vmatmul.bf16.vlgmr.msrb.gmra.mxu1 %v1057_v15  ;;  %1265 = vmatmul.bf16.vlgmr.msrb.gmra.mxu3 %v1057_v15  ;;  %v4377_v15 = vld [vmem:[#allocation34_spill] sm:$0xff] }
 0x1f2   : > { %v1046_v35 = vpop.f32.mrf.mxu3  ;;  %1381 = vmatpush.bf16.msrb.mxu1 %v3233_v7  ;;  %1407 = vmatpush.bf16.msrb.mxu3 %v3238_v12 }
 0x1f3   : > { %v1361_v35 = vunpack.c.l.bf16 %v3638_v1  ;;  %v4378_v1 = vld [vmem:[#allocation35_spill] sm:$0xff] }
 0x1f4   : > { %1370 = vmatpush.bf16.msrb.mxu0 %v3252_v29  ;;  %1396 = vmatpush.bf16.msrb.mxu2 %v3258_v34 }
 0x1f6   : > { %1382 = vmatpush.bf16.msrb.mxu1 %v3244_v17  ;;  %1408 = vmatpush.bf16.msrb.mxu3 %v3249_v25 }
 0x1f8   : > { %1371 = vmatpush.bf16.msrb.mxu0 %v3264_v44  ;;  %1397 = vmatpush.bf16.msrb.mxu2 %v3270_v46 }
 0x1fa   : > { %1383 = vmatpush.bf16.msrb.mxu1 %v3256_v33  ;;  %1409 = vmatpush.bf16.msrb.mxu3 %v3261_v38 }
 0x1fc   : > { %1372 = vmatpush.bf16.msrb.mxu0 %v3276_v56  ;;  %1398 = vmatpush.bf16.msrb.mxu2 %v3282_v58 }
 0x1fe   : > { %1384 = vmatpush.bf16.msrb.mxu1 %v3268_v45  ;;  %1410 = vmatpush.bf16.msrb.mxu3 %v3273_v50 }
 0x200   : > { %1373 = vmatpush.bf16.msrb.mxu0 %v3288_v5  ;;  %1399 = vmatpush.bf16.msrb.mxu2 %v3294_v10 }
 0x202   : > { %1385 = vmatpush.bf16.msrb.mxu1 %v3280_v57  ;;  %1411 = vmatpush.bf16.msrb.mxu3 %v3285_v62 }
 0x204   : > { %1374 = vmatpush.bf16.msrb.mxu0 %v3301_v24  ;;  %1400 = vmatpush.bf16.msrb.mxu2 %v4369_v6  ;;  %v1364_v24 = vld [vmem:[#allocation1] sm:$0xff]  ;;  %v1365_v6 = vld [vmem:[#allocation1 + $0x9] sm:$0xff] }
 0x205   : > { %1533 = vst [vmem:[#allocation1] ss:$4 sm:$0xff] %v1361_v35  ;;  %v4379_v35 = vld [vmem:[#allocation36_spill] sm:$0xff] }
 0x206   : > { %1386 = vmatpush.bf16.msrb.mxu1 %v4370_v28  ;;  %1412 = vmatpush.bf16.msrb.mxu3 %v4371_v39 }
 0x208   : > { %1375 = vmatpush.bf16.msrb.mxu0 %v4372_v9  ;;  %1401 = vmatpush.bf16.msrb.mxu2 %v4373_v52 }
 0x20a   : > { %1387 = vmatpush.bf16.msrb.mxu1 %v4374_v37  ;;  %1413 = vmatpush.bf16.msrb.mxu3 %v4375_v31 }
 0x20e   : > { %1388 = vmatpush.bf16.msrb.mxu1 %v4376_v27  ;;  %1414 = vmatpush.bf16.msrb.mxu3 %v4377_v15 }
 0x268   : > { %v1227_v62 = vpop.f32.mrf.mxu0 }
 0x26e   : > { %v1240_v28 = vpop.f32.mrf.mxu1  ;;  %v1253_v39 = vpop.f32.mrf.mxu2 }
 0x26f   : > { %v1241_v57 = vadd.f32 %v1240_v28, %v1227_v62  ;;  %v4380_v28 = vld [vmem:[#allocation38_spill] sm:$0xff] }
 0x270   : > { %v1229_v9 = vpop.f32.mrf.mxu0 }
 0x271   : > { %v3713_v10 = vsub.f32 %v1054_v51, %v1241_v57  ;;  %v4381_v9 = vld [vmem:[#allocation40_spill] sm:$0xff] }
 0x273   : > { %v1272_v37 = vmul.f32 %v3713_v10, %v3713_v10 }
 0x274   : > { %v1266_v31 = vpop.f32.mrf.mxu3 }
 0x275   : > { %v1274_v52 = vpack.c.bf16 %v1272_v37, %v1272_v37  ;;  %v1267_v27 = vadd.f32 %v1266_v31, %v1253_v39  ;;  %v4384_v39 = vld [vmem:[#allocation42_spill] sm:$0xff]  ;;  %v4386_v37 = vld [vmem:[#allocation41_spill] sm:$0xff]  ;;  %v4387_v31 = vld [vmem:[#allocation43_spill] sm:$0xff] }
 0x276   : > { %v1242_v5 = vpop.f32.mrf.mxu1  ;;  %v1255_v15 = vpop.f32.mrf.mxu2 }
 0x277   : > { %v3717_v50 = vsub.f32 %v1055_v13, %v1267_v27  ;;  %1284 = vmatmul.bf16.vlgmr.msra.gmra.mxu0 %v1274_v52  ;;  %1310 = vmatmul.bf16.vlgmr.msra.gmra.mxu2 %v1274_v52  ;;  %v4382_v5 = vld [vmem:[#allocation37_spill] sm:$0xff]  ;;  %v4383_v13 = vld [vmem:[#allocation39_spill] sm:$0xff]  ;;  %v4385_v52 = vld [vmem:[#allocation44_spill] sm:$0xff] }
 0x278   : > { %1424 = vmatpush.bf16.msra.mxu0 %v4378_v1  ;;  %1450 = vmatpush.bf16.msra.mxu2 %v4379_v35  ;;  %v4388_v27 = vld [vmem:[#allocation46_spill] sm:$0xff]  ;;  %v4389_v15 = vld [vmem:[#allocation48_spill] sm:$0xff] }
 0x279   : > { %v1273_v57 = vmul.f32 %v3717_v50, %v3717_v50 }
 0x27b   : > { %v1275_v62 = vpack.c.bf16 %v1273_v57, %v1273_v57  ;;  %v4390_v57 = vld [vmem:[#allocation45_spill] sm:$0xff] }
 0x27c   : > { %v1268_v51 = vpop.f32.mrf.mxu3  ;;  %1425 = vmatpush.bf16.msra.mxu0 %v4380_v28  ;;  %1451 = vmatpush.bf16.msra.mxu2 %v4381_v9 }
 0x27d   : > { %1297 = vmatmul.bf16.vlgmr.msra.gmra.mxu1 %v1275_v62  ;;  %1323 = vmatmul.bf16.vlgmr.msra.gmra.mxu3 %v1275_v62  ;;  %v4391_v51 = vld [vmem:[#allocation47_spill] sm:$0xff]  ;;  %v4392_v62 = vld [vmem:[#allocation50_spill] sm:$0xff] }
 0x27e   : > { %1437 = vmatpush.bf16.msra.mxu1 %v4382_v5  ;;  %1463 = vmatpush.bf16.msra.mxu3 %v4383_v13  ;;  %v4393_v13 = vld [vmem:[#allocation52_spill] sm:$0xff] }
 0x280   : > { %1426 = vmatpush.bf16.msra.mxu0 %v4384_v39  ;;  %1452 = vmatpush.bf16.msra.mxu2 %v4385_v52  ;;  %v4394_v39 = vld [vmem:[#allocation49_spill] sm:$0xff]  ;;  %v4395_v52 = vld [vmem:[#allocation51_spill] sm:$0xff] }
 0x282   : > { %1438 = vmatpush.bf16.msra.mxu1 %v4386_v37  ;;  %1464 = vmatpush.bf16.msra.mxu3 %v4387_v31  ;;  %v4396_v37 = vld [vmem:[#allocation53_spill] sm:$0xff]  ;;  %v4397_v31 = vld [vmem:[#allocation54_spill] sm:$0xff] }
 0x284   : > { %1427 = vmatpush.bf16.msra.mxu0 %v4388_v27  ;;  %1453 = vmatpush.bf16.msra.mxu2 %v4389_v15  ;;  %v4398_v15 = vld [vmem:[#allocation55_spill] sm:$0xff] }
 0x286   : > { %1439 = vmatpush.bf16.msra.mxu1 %v4390_v57  ;;  %1465 = vmatpush.bf16.msra.mxu3 %v4391_v51  ;;  %v4399_v57 = vld [vmem:[#allocation56_spill] sm:$0xff]  ;;  %v4400_v51 = vld [vmem:[#allocation57_spill] sm:$0xff] }
 0x287   : > { %1376 = vmatmul.bf16.vlgmr.msrb.gmra.mxu0 %v1364_v24  ;;  %1402 = vmatmul.bf16.vlgmr.msrb.gmra.mxu2 %v1364_v24  ;;  %v4401_v24 = vld [vmem:[#allocation58_spill] sm:$0xff] }
 0x288   : > { %1428 = vmatpush.bf16.msra.mxu0 %v4392_v62  ;;  %1454 = vmatpush.bf16.msra.mxu2 %v4393_v13  ;;  %v4402_v62 = vld [vmem:[#allocation59_spill] sm:$0xff]  ;;  %v4403_v13 = vld [vmem:[#allocation60_spill] sm:$0xff] }
 0x28a   : > { %1440 = vmatpush.bf16.msra.mxu1 %v4394_v39  ;;  %1466 = vmatpush.bf16.msra.mxu3 %v4395_v52  ;;  %v4404_v39 = vld [vmem:[#allocation61_spill] sm:$0xff]  ;;  %v4405_v52 = vld [vmem:[#allocation62_spill] sm:$0xff] }
 0x28c   : > { %1429 = vmatpush.bf16.msra.mxu0 %v4396_v37  ;;  %1455 = vmatpush.bf16.msra.mxu2 %v4397_v31  ;;  %v4406_v37 = vld [vmem:[#allocation67_spill] sm:$0xff]  ;;  %v4407_v31 = vld [vmem:[#allocation68_spill] sm:$0xff] }
 0x28d   : > { %1389 = vmatmul.bf16.vlgmr.msrb.gmra.mxu1 %v1365_v6  ;;  %1415 = vmatmul.bf16.vlgmr.msrb.gmra.mxu3 %v1365_v6  ;;  %v4408_v6 = vld [vmem:[#allocation63_spill] sm:$0xff] }
 0x28e   : > { %1441 = vmatpush.bf16.msra.mxu1 %v4398_v15  ;;  %1467 = vmatpush.bf16.msra.mxu3 %v4399_v57  ;;  %v4409_v15 = vld [vmem:[#allocation64_spill] sm:$0xff]  ;;  %v4410_v57 = vld [vmem:[#allocation69_spill] sm:$0xff] }
 0x290   : > { %1430 = vmatpush.bf16.msra.mxu0 %v4400_v51  ;;  %1456 = vmatpush.bf16.msra.mxu2 %v4401_v24  ;;  %v4411_v51 = vld [vmem:[#allocation70_spill] sm:$0xff]  ;;  %v4412_v24 = vld [vmem:[#allocation65_spill] sm:$0xff] }
 0x292   : > { %1442 = vmatpush.bf16.msra.mxu1 %v4402_v62  ;;  %1468 = vmatpush.bf16.msra.mxu3 %v4403_v13  ;;  %v4413_v62 = vld [vmem:[#allocation66_spill] sm:$0xff]  ;;  %v4414_v13 = vld [vmem:[#allocation71_spill] sm:$0xff] }
 0x294   : > { %1431 = vmatpush.bf16.msra.mxu0 %v4404_v39  ;;  %1457 = vmatpush.bf16.msra.mxu2 %v4405_v52  ;;  %v4415_v39 = vld [vmem:[#allocation72_spill] sm:$0xff]  ;;  %v4416_v52 = vld [vmem:[#allocation74_spill] sm:$0xff] }
 0x296   : > { %1443 = vmatpush.bf16.msra.mxu1 %v4408_v6  ;;  %1469 = vmatpush.bf16.msra.mxu3 %v4409_v15  ;;  %v4419_v6 = vld [vmem:[#allocation75_spill] sm:$0xff] }
 0x297   : > { %v4420_v15 = vld [vmem:[#allocation79_spill] sm:$0xff] }
 0x298   : > { %1480 = vmatpush.bf16.msrb.mxu0 %v4406_v37  ;;  %1506 = vmatpush.bf16.msrb.mxu2 %v4407_v31  ;;  %v4417_v37 = vld [vmem:[#allocation76_spill] sm:$0xff]  ;;  %v4418_v31 = vld [vmem:[#allocation73_spill] sm:$0xff] }
 0x29a   : > { %1444 = vmatpush.bf16.msra.mxu1 %v4412_v24  ;;  %1470 = vmatpush.bf16.msra.mxu3 %v4413_v62  ;;  %v4423_v24 = vld [vmem:[#allocation78_spill] sm:$0xff] }
 0x29b   : > { %v4424_v62 = vld [vmem:[#allocation82_spill] sm:$0xff] }
 0x29c   : > { %1481 = vmatpush.bf16.msrb.mxu0 %v4410_v57  ;;  %1507 = vmatpush.bf16.msrb.mxu2 %v4411_v51  ;;  %v4421_v57 = vld [vmem:[#allocation80_spill] sm:$0xff]  ;;  %v4422_v51 = vld [vmem:[#allocation77_spill] sm:$0xff] }
 0x29e   : > { %1493 = vmatpush.bf16.msrb.mxu1 %v4414_v13  ;;  %1519 = vmatpush.bf16.msrb.mxu3 %v4415_v39  ;;  %v4425_v13 = vld [vmem:[#allocation83_spill] sm:$0xff]  ;;  %v4426_v39 = vld [vmem:[#allocation85_spill] sm:$0xff] }
 0x2a0   : > { %1482 = vmatpush.bf16.msrb.mxu0 %v4416_v52  ;;  %1508 = vmatpush.bf16.msrb.mxu2 %v4417_v37  ;;  %v4427_v52 = vld [vmem:[#allocation86_spill] sm:$0xff]  ;;  %v4428_v37 = vld [vmem:[#allocation87_spill] sm:$0xff] }
 0x2a2   : > { %1494 = vmatpush.bf16.msrb.mxu1 %v4418_v31  ;;  %1520 = vmatpush.bf16.msrb.mxu3 %v4419_v6  ;;  %v4429_v31 = vld [vmem:[#allocation88_spill] sm:$0xff]  ;;  %v4430_v6 = vld [vmem:[#allocation89_spill] sm:$0xff] }
 0x2a4   : > { %1483 = vmatpush.bf16.msrb.mxu0 %v4420_v15  ;;  %1509 = vmatpush.bf16.msrb.mxu2 %v4421_v57  ;;  %v4431_v15 = vld [vmem:[#allocation90_spill] sm:$0xff]  ;;  %v4432_v57 = vld [vmem:[#allocation91_spill] sm:$0xff] }
 0x2a6   : > { %1495 = vmatpush.bf16.msrb.mxu1 %v4422_v51  ;;  %1521 = vmatpush.bf16.msrb.mxu3 %v4423_v24  ;;  %v4433_v51 = vld [vmem:[#allocation92_spill] sm:$0xff]  ;;  %v4434_v24 = vld [vmem:[#allocation93_spill] sm:$0xff] }
 0x2a8   : > { %1484 = vmatpush.bf16.msrb.mxu0 %v4424_v62  ;;  %1510 = vmatpush.bf16.msrb.mxu2 %v4425_v13  ;;  %v4435_v62 = vld [vmem:[#allocation94_spill] sm:$0xff]  ;;  %v4436_v13 = vld [vmem:[#allocation95_spill] sm:$0xff] }
 0x2aa   : > { %1496 = vmatpush.bf16.msrb.mxu1 %v4426_v39  ;;  %1522 = vmatpush.bf16.msrb.mxu3 %v4427_v52  ;;  %v4437_v39 = vld [vmem:[#allocation96_spill] sm:$0xff]  ;;  %v4438_v52 = vld [vmem:[#allocation97_spill] sm:$0xff] }
 0x2ac   : > { %1485 = vmatpush.bf16.msrb.mxu0 %v4428_v37  ;;  %1511 = vmatpush.bf16.msrb.mxu2 %v4429_v31  ;;  %v4439_v37 = vld [vmem:[#allocation98_spill] sm:$0xff]  ;;  %v4440_v31 = vld [vmem:[#allocation99_spill] sm:$0xff] }
 0x2ae   : > { %1497 = vmatpush.bf16.msrb.mxu1 %v4430_v6  ;;  %1523 = vmatpush.bf16.msrb.mxu3 %v4431_v15  ;;  %v4441_v6 = vld [vmem:[#allocation100_spill] sm:$0xff]  ;;  %v3100_v15 = vmov 0.0  }
 0x2af   : > { %256 = vst [vmem:[#allocation2] sm:$0xf] %v3100_v15 }
 0x2b0   : > { %1486 = vmatpush.bf16.msrb.mxu0 %v4432_v57  ;;  %1512 = vmatpush.bf16.msrb.mxu2 %v4433_v51 }
 0x2b2   : > { %1498 = vmatpush.bf16.msrb.mxu1 %v4434_v24  ;;  %1524 = vmatpush.bf16.msrb.mxu3 %v4435_v62 }
 0x2b4   : > { %1487 = vmatpush.bf16.msrb.mxu0 %v4436_v13  ;;  %1513 = vmatpush.bf16.msrb.mxu2 %v4437_v39 }
 0x2b6   : > { %1499 = vmatpush.bf16.msrb.mxu1 %v4438_v52  ;;  %1525 = vmatpush.bf16.msrb.mxu3 %v4439_v37 }
 0x2ba   : > { %1500 = vmatpush.bf16.msrb.mxu1 %v4440_v31  ;;  %1526 = vmatpush.bf16.msrb.mxu3 %v4441_v6  ;;  %v4442_v6 = vld [vmem:[#allocation81_spill] sm:$0xff] }
 0x2f4   : > { %v1285_v57 = vpop.f32.mrf.mxu0 }
 0x2f5   : > { %v1286_v51 = vadd.f32 1e-05, %v1285_v57 }
 0x2fa   : > { %v1298_v27 = vpop.f32.mrf.mxu1  ;;  %v1311_v24 = vpop.f32.mrf.mxu2 }
 0x2fb   : > { %v1299_v5 = vadd.f32 %v1298_v27, %v1286_v51  ;;  %v1312_v13 = vadd.f32 1e-05, %v1311_v24 }
 0x2fc   : > { %v1287_v62 = vpop.f32.mrf.mxu0 }
 0x2fd   : > { %2902 = vrsqrt.f32 %v1299_v5  ;;  %vm1334_vm2 = vweird.f32 %v1299_v5 }
 0x300   : > { %v1324_v9 = vpop.f32.mrf.mxu3 }
 0x301   : > { %v1325_v39 = vadd.f32 %v1324_v9, %v1312_v13 }
 0x302   : > { %v1300_v28 = vpop.f32.mrf.mxu1  ;;  %v1313_v52 = vpop.f32.mrf.mxu2 }
 0x303   : > { %v2903_v35 = vpop.eup %2902  ;;  %2904 = vrsqrt.f32 %v1325_v39  ;;  %v4443_v28 = vld [vmem:[#allocation84_spill] sm:$0xff]  ;;  %vm1344_vm4 = vweird.f32 %v1325_v39 }
 0x304   : > { %v1329_v37 = vmul.f32 %v2903_v35, %v1299_v5  ;;  %v1377_v31 = vpop.f32.mrf.mxu0  ;;  %vm1335_vm0 = vweird.f32 %v2903_v35 }
 0x305   : > { %v1378_v45 = vadd.f32 %v1377_v31, %v4442_v6  ;;  %vm3787_vm3 = vmor %vm1334_vm2, %vm1335_vm0 }
 0x306   : > { %v1330_v1 = vmul.f32 %v2903_v35, %v1329_v37 }
 0x308   : > { %v1331_v15 = vmul.f32 0.5, %v1330_v1  ;;  %v1326_v58 = vpop.f32.mrf.mxu3 }
 0x309   : > { %v2905_v57 = vpop.eup %2904 }
 0x30a   : > { %v1339_v56 = vmul.f32 %v2905_v57, %v1325_v39  ;;  %v1390_v38 = vpop.f32.mrf.mxu1  ;;  %v1403_v27 = vpop.f32.mrf.mxu2  ;;  %v1332_v62 = vsub.f32 1.5, %v1331_v15  ;;  %vm1345_vm1 = vweird.f32 %v2905_v57 }
 0x30b   : > { %v1391_v51 = vadd.f32 %v1390_v38, %v1378_v45  ;;  %v1404_v13 = vadd.f32 %v1403_v27, %v4443_v28  ;;  %vm1346_vm5 = vmor %vm1344_vm4, %vm1345_vm1 }
 0x30c   : > { %v1340_v24 = vmul.f32 %v2905_v57, %v1339_v56  ;;  %v1379_v33 = vpop.f32.mrf.mxu0  ;;  %v1333_v44 = vmul.f32 %v2903_v35, %v1332_v62 }
 0x30d   : > { %v1420_v9 = vmax.f32 %v1391_v51, 0.0  ;;  %v1350_v51 = vld [vmem:[#allocation2] sm:$0xf] }
 0x30e   : > { %v1341_v52 = vmul.f32 0.5, %v1340_v24  ;;  %v1337_v5 = vsel %vm3787_vm3, %v2903_v35, %v1333_v44  ;;  %v4447_v35 = vld [vmem:[#allocation104_spill] sm:$0xff] }
 0x30f   : > { %v1422_v46 = vpack.c.bf16 %v1420_v9, %v1420_v9  ;;  %v1348_v39 = vmul.f32 %v1337_v5, %v3713_v10  ;;  %v4446_v10 = vld [vmem:[#allocation103_spill] sm:$0xff]  ;;  %v4449_v9 = vld [vmem:[#allocation106_spill] sm:$0xff] }
 0x310   : > { %v1342_v37 = vsub.f32 1.5, %v1341_v52  ;;  %v1416_v31 = vpop.f32.mrf.mxu3 }
 0x311   : > { %v1417_v58 = vadd.f32 %v1416_v31, %v1404_v13  ;;  %1432 = vmatmul.bf16.vlgmr.msra.gmra.mxu0 %v1422_v46  ;;  %1458 = vmatmul.bf16.vlgmr.msra.gmra.mxu2 %v1422_v46  ;;  %v4450_v13 = vld [vmem:[#allocation107_spill] sm:$0xff] }
 0x312   : > { %v1343_v38 = vmul.f32 %v2905_v57, %v1342_v37  ;;  %v1392_v33 = vpop.f32.mrf.mxu1  ;;  %v1405_v45 = vpop.f32.mrf.mxu2  ;;  %1542 = vmatpush.bf16.msra.mxu0 %v3532_v36  ;;  %1568 = vmatpush.bf16.msra.mxu2 %v3534_v55  ;;  %v4451_v37 = vld [vmem:[#allocation101_spill] sm:$0xff] }
 0x313   : > { %v1421_v56 = vmax.f32 %v1417_v58, 0.0 }
 0x314   : > { %v1347_v15 = vsel %vm1346_vm5, %v2905_v57, %v1343_v38  ;;  %v4448_v57 = vld [vmem:[#allocation105_spill] sm:$0xff] }
 0x315   : > { %v1349_v46 = vmul.f32 %v1347_v15, %v3717_v50  ;;  %v1423_v27 = vpack.c.bf16 %v1421_v56, %v1421_v56  ;;  %v4452_v56 = vld [vmem:[#allocation102_spill] sm:$0xff] }
 0x316   : > { %1543 = vmatpush.bf16.msra.mxu0 %v3537_v2  ;;  %1569 = vmatpush.bf16.msra.mxu2 %v3540_v26 }
 0x317   : > { %v1353_v62 = vrot.slane %v1349_v46, 6  ;;  %1445 = vmatmul.bf16.vlgmr.msra.gmra.mxu1 %v1423_v27  ;;  %1471 = vmatmul.bf16.vlgmr.msra.gmra.mxu3 %v1423_v27 }
 0x318   : > { %v1418_v24 = vpop.f32.mrf.mxu3  ;;  %1555 = vmatpush.bf16.msra.mxu1 %v3542_v60  ;;  %1581 = vmatpush.bf16.msra.mxu3 %v3544_v32 }
 0x319   : > { %v1355_v44 = vsel %vm1354_vm6, %v1348_v39, %v1353_v62 }
 0x31a   : > { %v1357_v50 = vadd.f32 %v1355_v44, %v1350_v51  ;;  %1544 = vmatpush.bf16.msra.mxu0 %v3551_v11  ;;  %1570 = vmatpush.bf16.msra.mxu2 %v3556_v49 }
 0x31c   : > { %1358 = vst [vmem:[#allocation2] sm:$0xf] %v1357_v50  ;;  %1556 = vmatpush.bf16.msra.mxu1 %v3548_v42  ;;  %1582 = vmatpush.bf16.msra.mxu3 %v3553_v4 }
 0x31e   : > { %1545 = vmatpush.bf16.msra.mxu0 %v3568_v30  ;;  %1571 = vmatpush.bf16.msra.mxu2 %v3571_v61 }
 0x320   : > { %1557 = vmatpush.bf16.msra.mxu1 %v3560_v53  ;;  %1583 = vmatpush.bf16.msra.mxu3 %v3562_v40 }
 0x322   : > { %1546 = vmatpush.bf16.msra.mxu0 %v3577_v48  ;;  %1572 = vmatpush.bf16.msra.mxu2 %v3580_v41 }
 0x324   : > { %1558 = vmatpush.bf16.msra.mxu1 %v4446_v10  ;;  %1584 = vmatpush.bf16.msra.mxu3 %v4447_v35 }
 0x326   : > { %1547 = vmatpush.bf16.msra.mxu0 %v4448_v57  ;;  %1573 = vmatpush.bf16.msra.mxu2 %v3596_v59 }
 0x328   : > { %1559 = vmatpush.bf16.msra.mxu1 %v3598_v14  ;;  %1585 = vmatpush.bf16.msra.mxu3 %v4449_v9 }
 0x32a   : > { %1548 = vmatpush.bf16.msra.mxu0 %v3605_v43  ;;  %1574 = vmatpush.bf16.msra.mxu2 %v4450_v13 }
 0x32c   : > { %1560 = vmatpush.bf16.msra.mxu1 %v3611_v18  ;;  %1586 = vmatpush.bf16.msra.mxu3 %v3615_v22 }
 0x32e   : > { %1549 = vmatpush.bf16.msra.mxu0 %v3617_v20  ;;  %1575 = vmatpush.bf16.msra.mxu2 %v3619_v47 }
 0x330   : > { %1561 = vmatpush.bf16.msra.mxu1 %v3623_v63  ;;  %1587 = vmatpush.bf16.msra.mxu3 %v3626_v23 }
 0x334   : > { %1562 = vmatpush.bf16.msra.mxu1 %v3632_v0  ;;  %1588 = vmatpush.bf16.msra.mxu3 %v3634_v54 }
 0x38e   : > { %v1433_v52 = vpop.f32.mrf.mxu0 }
 0x38f   : > { %v1434_v31 = vadd.f32 %v1433_v52, %v4451_v37  ;;  %v4453_v52 = vld [vmem:[#allocation108_spill] sm:$0xff] }
 0x394   : > { %v1446_v58 = vpop.f32.mrf.mxu1  ;;  %v1459_v1 = vpop.f32.mrf.mxu2 }
 0x395   : > { %v1447_v38 = vadd.f32 %v1446_v58, %v1434_v31  ;;  %v1460_v5 = vadd.f32 %v1459_v1, %v4452_v56  ;;  %v1534_v1 = vld.sshfl [vmem:[#allocation1] sm:$0xff pattern:$0x73625140] }
 0x396   : > { %v1435_v33 = vpop.f32.mrf.mxu0 }
 0x397   : > { %v1476_v45 = vmax.f32 %v1447_v38, 0.0 }
 0x399   : > { %v1478_v15 = vpack.c.bf16 %v1476_v45, %v1476_v45 }
 0x39a   : > { %v1472_v46 = vpop.f32.mrf.mxu3 }
 0x39b   : > { %v1473_v27 = vadd.f32 %v1472_v46, %v1460_v5  ;;  %1488 = vmatmul.bf16.vlgmr.msrb.gmra.mxu0 %v1478_v15  ;;  %1514 = vmatmul.bf16.vlgmr.msrb.gmra.mxu2 %v1478_v15 }
 0x39c   : > { %v1448_v39 = vpop.f32.mrf.mxu1  ;;  %v1461_v51 = vpop.f32.mrf.mxu2  ;;  %1600 = vmatpush.bf16.msrb.mxu0 %v3532_v36  ;;  %1626 = vmatpush.bf16.msrb.mxu2 %v3534_v55 }
 0x39d   : > { %v1477_v62 = vmax.f32 %v1473_v27, 0.0  ;;  %v1535_v39 = vld.sshfl [vmem:[#allocation1 + $0x8] sm:$0xff pattern:$0x73625140] }
 0x39f   : > { %v1479_v24 = vpack.c.bf16 %v1477_v62, %v1477_v62 }
 0x3a0   : > { %1601 = vmatpush.bf16.msrb.mxu0 %v3537_v2  ;;  %1627 = vmatpush.bf16.msrb.mxu2 %v3540_v26 }
 0x3a1   : > { %1501 = vmatmul.bf16.vlgmr.msrb.gmra.mxu1 %v1479_v24  ;;  %1527 = vmatmul.bf16.vlgmr.msrb.gmra.mxu3 %v1479_v24 }
 0x3a2   : > { %v1474_v44 = vpop.f32.mrf.mxu3  ;;  %1613 = vmatpush.bf16.msrb.mxu1 %v3542_v60  ;;  %1639 = vmatpush.bf16.msrb.mxu3 %v3544_v32 }
 0x3a4   : > { %1602 = vmatpush.bf16.msrb.mxu0 %v3551_v11  ;;  %1628 = vmatpush.bf16.msrb.mxu2 %v3556_v49 }
 0x3a6   : > { %1614 = vmatpush.bf16.msrb.mxu1 %v3548_v42  ;;  %1640 = vmatpush.bf16.msrb.mxu3 %v3553_v4 }
 0x3a8   : > { %1603 = vmatpush.bf16.msrb.mxu0 %v3568_v30  ;;  %1629 = vmatpush.bf16.msrb.mxu2 %v3571_v61 }
 0x3aa   : > { %1615 = vmatpush.bf16.msrb.mxu1 %v3560_v53  ;;  %1641 = vmatpush.bf16.msrb.mxu3 %v3562_v40 }
 0x3ac   : > { %1604 = vmatpush.bf16.msrb.mxu0 %v3577_v48  ;;  %1630 = vmatpush.bf16.msrb.mxu2 %v3580_v41 }
 0x3ae   : > { %1616 = vmatpush.bf16.msrb.mxu1 %v4446_v10  ;;  %1642 = vmatpush.bf16.msrb.mxu3 %v4447_v35 }
 0x3b0   : > { %1605 = vmatpush.bf16.msrb.mxu0 %v4448_v57  ;;  %1631 = vmatpush.bf16.msrb.mxu2 %v3596_v59 }
 0x3b2   : > { %1617 = vmatpush.bf16.msrb.mxu1 %v3598_v14  ;;  %1643 = vmatpush.bf16.msrb.mxu3 %v4449_v9 }
 0x3b4   : > { %1606 = vmatpush.bf16.msrb.mxu0 %v3605_v43  ;;  %1632 = vmatpush.bf16.msrb.mxu2 %v4450_v13 }
 0x3b6   : > { %1618 = vmatpush.bf16.msrb.mxu1 %v3611_v18  ;;  %1644 = vmatpush.bf16.msrb.mxu3 %v3615_v22 }
 0x3b8   : > { %1607 = vmatpush.bf16.msrb.mxu0 %v3617_v20  ;;  %1633 = vmatpush.bf16.msrb.mxu2 %v3619_v47 }
 0x3ba   : > { %1619 = vmatpush.bf16.msrb.mxu1 %v3623_v63  ;;  %1645 = vmatpush.bf16.msrb.mxu3 %v3626_v23 }
 0x3be   : > { %1620 = vmatpush.bf16.msrb.mxu1 %v3632_v0  ;;  %1646 = vmatpush.bf16.msrb.mxu3 %v3634_v54 }
 0x418   : > { %v1489_v50 = vpop.f32.mrf.mxu0 }
 0x419   : > { %v1490_v31 = vadd.f32 %v1489_v50, %v4453_v52 }
 0x41e   : > { %v1502_v58 = vpop.f32.mrf.mxu1  ;;  %v1515_v38 = vpop.f32.mrf.mxu2 }
 0x41f   : > { %v1503_v33 = vadd.f32 %v1502_v58, %v1490_v31  ;;  %v1516_v46 = vadd.f32 %v1515_v38, %v3670_v19  ;;  %v4458_v58 = vld [vmem:[#allocation19_spill] sm:$0xff] }
 0x420   : > { %v1491_v45 = vpop.f32.mrf.mxu0  ;;  %v4466_v38 = vld [vmem:[#allocation27_spill] sm:$0xff] }
 0x421   : > { %v1538_v5 = vadd.f32 %v1534_v1, %v1503_v33  ;;  %v4465_v1 = vld [vmem:[#allocation22_spill] sm:$0xff]  ;;  %v4467_v33 = vld [vmem:[#allocation29_spill] sm:$0xff]  ;;  %v4468_v45 = vld [vmem:[#allocation24_spill] sm:$0xff] }
 0x423   : > { %v1540_v15 = vpack.c.bf16 %v1538_v5, %v1538_v5 }
 0x424   : > { %v1528_v27 = vpop.f32.mrf.mxu3 }
 0x425   : > { %v1529_v51 = vadd.f32 %v1528_v27, %v1516_v46  ;;  %1550 = vmatmul.bf16.vlgmr.msra.gmra.mxu0 %v1540_v15  ;;  %1576 = vmatmul.bf16.vlgmr.msra.gmra.mxu2 %v1540_v15  ;;  %v4469_v15 = vld [vmem:[#allocation26_spill] sm:$0xff]  ;;  %v4470_v46 = vld [vmem:[#allocation31_spill] sm:$0xff]  ;;  %v4471_v27 = vld [vmem:[#allocation33_spill] sm:$0xff] }
 0x426   : > { %v1504_v62 = vpop.f32.mrf.mxu1  ;;  %v1517_v24 = vpop.f32.mrf.mxu2  ;;  %1691 = vmatpush.bf16.msra.mxu0 %v3231_v3  ;;  %1717 = vmatpush.bf16.msra.mxu2 %v3235_v8  ;;  %v4454_v3 = vld [vmem:[#allocation15_spill] sm:$0xff]  ;;  %v4455_v8 = vld [vmem:[#allocation17_spill] sm:$0xff] }
 0x427   : > { %v1539_v44 = vadd.f32 %v1535_v39, %v1529_v51  ;;  %v4472_v39 = vld [vmem:[#allocation28_spill] sm:$0xff]  ;;  %v4473_v51 = vld [vmem:[#allocation30_spill] sm:$0xff] }
 0x428   : > { %v4474_v62 = vld [vmem:[#allocation32_spill] sm:$0xff]  ;;  %v4475_v24 = vld [vmem:[#allocation34_spill] sm:$0xff] }
 0x429   : > { %v1541_v50 = vpack.c.bf16 %v1539_v44, %v1539_v44 }
 0x42a   : > { %1692 = vmatpush.bf16.msra.mxu0 %v3242_v16  ;;  %1718 = vmatpush.bf16.msra.mxu2 %v3247_v21  ;;  %v4456_v16 = vld [vmem:[#allocation13_spill] sm:$0xff]  ;;  %v4457_v21 = vld [vmem:[#allocation14_spill] sm:$0xff] }
 0x42b   : > { %1563 = vmatmul.bf16.vlgmr.msra.gmra.mxu1 %v1541_v50  ;;  %1589 = vmatmul.bf16.vlgmr.msra.gmra.mxu3 %v1541_v50  ;;  %v2676_v50 = vld [vmem:[%s3221_s29 + $0x4] sm:$0x3] }
 0x42c   : > { %v1530_v31 = vpop.f32.mrf.mxu3  ;;  %1704 = vmatpush.bf16.msra.mxu1 %v3233_v7  ;;  %1730 = vmatpush.bf16.msra.mxu3 %v3238_v12  ;;  %v4459_v7 = vld [vmem:[#allocation21_spill] sm:$0xff]  ;;  %v4460_v12 = vld [vmem:[#allocation16_spill] sm:$0xff]  ;;  %1686 = vst [vmem:[#allocation1] ss:$9 sm:$0xff] %v2676_v50 }
 0x42d   : > { %v1684_v31 = vunpack.c.l.bf16 %v2676_v50  ;;  %v4482_v50 = vld [vmem:[#allocation42_spill] sm:$0xff] }
 0x42e   : > { %1693 = vmatpush.bf16.msra.mxu0 %v3252_v29  ;;  %1719 = vmatpush.bf16.msra.mxu2 %v3258_v34  ;;  %v4461_v29 = vld [vmem:[#allocation18_spill] sm:$0xff]  ;;  %v4464_v34 = vld [vmem:[#allocation20_spill] sm:$0xff] }
 0x430   : > { %1705 = vmatpush.bf16.msra.mxu1 %v3244_v17  ;;  %1731 = vmatpush.bf16.msra.mxu3 %v3249_v25  ;;  %v4462_v17 = vld [vmem:[#allocation23_spill] sm:$0xff]  ;;  %v4463_v25 = vld [vmem:[#allocation25_spill] sm:$0xff] }
 0x432   : > { %1694 = vmatpush.bf16.msra.mxu0 %v4454_v3  ;;  %1720 = vmatpush.bf16.msra.mxu2 %v4455_v8 }
 0x433   : > { %v1687_v3 = vld [vmem:[#allocation1] sm:$0xff]  ;;  %v1688_v8 = vld [vmem:[#allocation1 + $0x9] sm:$0xff] }
 0x434   : > { %1706 = vmatpush.bf16.msra.mxu1 %v4456_v16  ;;  %1732 = vmatpush.bf16.msra.mxu3 %v4457_v21  ;;  %1856 = vst [vmem:[#allocation1] ss:$4 sm:$0xff] %v1684_v31  ;;  %v4483_v31 = vld [vmem:[#allocation44_spill] sm:$0xff] }
 0x436   : > { %1695 = vmatpush.bf16.msra.mxu0 %v4458_v58  ;;  %1721 = vmatpush.bf16.msra.mxu2 %v4459_v7 }
 0x438   : > { %1707 = vmatpush.bf16.msra.mxu1 %v4460_v12  ;;  %1733 = vmatpush.bf16.msra.mxu3 %v4461_v29 }
 0x43a   : > { %1696 = vmatpush.bf16.msra.mxu0 %v4462_v17  ;;  %1722 = vmatpush.bf16.msra.mxu2 %v4463_v25 }
 0x43c   : > { %1708 = vmatpush.bf16.msra.mxu1 %v4464_v34  ;;  %1734 = vmatpush.bf16.msra.mxu3 %v4465_v1 }
 0x43e   : > { %1697 = vmatpush.bf16.msra.mxu0 %v4466_v38  ;;  %1723 = vmatpush.bf16.msra.mxu2 %v4467_v33 }
 0x440   : > { %1709 = vmatpush.bf16.msra.mxu1 %v4468_v45  ;;  %1735 = vmatpush.bf16.msra.mxu3 %v4469_v15  ;;  %v4476_v15 = vld [vmem:[#allocation35_spill] sm:$0xff] }
 0x442   : > { %1698 = vmatpush.bf16.msra.mxu0 %v4470_v46  ;;  %1724 = vmatpush.bf16.msra.mxu2 %v4471_v27  ;;  %v4477_v46 = vld [vmem:[#allocation36_spill] sm:$0xff] }
 0x444   : > { %1710 = vmatpush.bf16.msra.mxu1 %v4472_v39  ;;  %1736 = vmatpush.bf16.msra.mxu3 %v4473_v51  ;;  %v4478_v51 = vld [vmem:[#allocation38_spill] sm:$0xff] }
 0x448   : > { %1711 = vmatpush.bf16.msra.mxu1 %v4474_v62  ;;  %1737 = vmatpush.bf16.msra.mxu3 %v4475_v24  ;;  %v4479_v62 = vld [vmem:[#allocation40_spill] sm:$0xff]  ;;  %v4480_v24 = vld [vmem:[#allocation37_spill] sm:$0xff] }
 0x4a2   : > { %v1551_v16 = vpop.f32.mrf.mxu0 }
 0x4a8   : > { %v1564_v21 = vpop.f32.mrf.mxu1  ;;  %v1577_v58 = vpop.f32.mrf.mxu2 }
 0x4a9   : > { %v1565_v7 = vadd.f32 %v1564_v21, %v1551_v16  ;;  %v4484_v16 = vld [vmem:[#allocation41_spill] sm:$0xff]  ;;  %v4485_v21 = vld [vmem:[#allocation43_spill] sm:$0xff] }
 0x4aa   : > { %v1553_v12 = vpop.f32.mrf.mxu0 }
 0x4ab   : > { %v3897_v29 = vsub.f32 %v1538_v5, %v1565_v7  ;;  %v4487_v7 = vld [vmem:[#allocation48_spill] sm:$0xff]  ;;  %v4488_v12 = vld [vmem:[#allocation45_spill] sm:$0xff] }
 0x4ad   : > { %v1596_v17 = vmul.f32 %v3897_v29, %v3897_v29 }
 0x4ae   : > { %v1590_v25 = vpop.f32.mrf.mxu3 }
 0x4af   : > { %v1598_v34 = vpack.c.bf16 %v1596_v17, %v1596_v17  ;;  %v1591_v1 = vadd.f32 %v1590_v25, %v1577_v58  ;;  %v4486_v58 = vld [vmem:[#allocation46_spill] sm:$0xff]  ;;  %v4489_v17 = vld [vmem:[#allocation47_spill] sm:$0xff] }
 0x4b0   : > { %v1566_v38 = vpop.f32.mrf.mxu1  ;;  %v1579_v33 = vpop.f32.mrf.mxu2  ;;  %v4490_v25 = vld [vmem:[#allocation50_spill] sm:$0xff] }
 0x4b1   : > { %v3901_v45 = vsub.f32 %v1539_v44, %v1591_v1  ;;  %1608 = vmatmul.bf16.vlgmr.msrb.gmra.mxu0 %v1598_v34  ;;  %1634 = vmatmul.bf16.vlgmr.msrb.gmra.mxu2 %v1598_v34  ;;  %v4481_v44 = vld [vmem:[#allocation39_spill] sm:$0xff]  ;;  %v4491_v34 = vld [vmem:[#allocation52_spill] sm:$0xff]  ;;  %v4492_v1 = vld [vmem:[#allocation49_spill] sm:$0xff] }
 0x4b2   : > { %1747 = vmatpush.bf16.msrb.mxu0 %v4476_v15  ;;  %1773 = vmatpush.bf16.msrb.mxu2 %v4477_v46  ;;  %v4493_v38 = vld [vmem:[#allocation51_spill] sm:$0xff]  ;;  %v4494_v33 = vld [vmem:[#allocation53_spill] sm:$0xff]  ;;  %v4495_v15 = vld [vmem:[#allocation54_spill] sm:$0xff] }
 0x4b3   : > { %v1597_v5 = vmul.f32 %v3901_v45, %v3901_v45  ;;  %v4496_v46 = vld [vmem:[#allocation55_spill] sm:$0xff] }
 0x4b5   : > { %v1599_v27 = vpack.c.bf16 %v1597_v5, %v1597_v5  ;;  %v4497_v5 = vld [vmem:[#allocation56_spill] sm:$0xff] }
 0x4b6   : > { %v1592_v39 = vpop.f32.mrf.mxu3  ;;  %1748 = vmatpush.bf16.msrb.mxu0 %v4478_v51  ;;  %1774 = vmatpush.bf16.msrb.mxu2 %v4479_v62  ;;  %v4501_v51 = vld [vmem:[#allocation60_spill] sm:$0xff]  ;;  %v4502_v62 = vld [vmem:[#allocation61_spill] sm:$0xff] }
 0x4b7   : > { %1621 = vmatmul.bf16.vlgmr.msrb.gmra.mxu1 %v1599_v27  ;;  %1647 = vmatmul.bf16.vlgmr.msrb.gmra.mxu3 %v1599_v27  ;;  %v4498_v27 = vld [vmem:[#allocation57_spill] sm:$0xff]  ;;  %v4500_v39 = vld [vmem:[#allocation59_spill] sm:$0xff] }
 0x4b8   : > { %1760 = vmatpush.bf16.msrb.mxu1 %v4480_v24  ;;  %1786 = vmatpush.bf16.msrb.mxu3 %v4481_v44  ;;  %v4503_v24 = vld [vmem:[#allocation62_spill] sm:$0xff]  ;;  %v4504_v44 = vld [vmem:[#allocation67_spill] sm:$0xff] }
 0x4ba   : > { %1749 = vmatpush.bf16.msrb.mxu0 %v4482_v50  ;;  %1775 = vmatpush.bf16.msrb.mxu2 %v4483_v31  ;;  %v4505_v50 = vld [vmem:[#allocation68_spill] sm:$0xff] }
 0x4bb   : > { %v4507_v31 = vld [vmem:[#allocation64_spill] sm:$0xff] }
 0x4bc   : > { %1761 = vmatpush.bf16.msrb.mxu1 %v4484_v16  ;;  %1787 = vmatpush.bf16.msrb.mxu3 %v4485_v21  ;;  %v4508_v16 = vld [vmem:[#allocation69_spill] sm:$0xff]  ;;  %v4509_v21 = vld [vmem:[#allocation70_spill] sm:$0xff] }
 0x4be   : > { %1750 = vmatpush.bf16.msrb.mxu0 %v4486_v58  ;;  %1776 = vmatpush.bf16.msrb.mxu2 %v4487_v7  ;;  %v4510_v58 = vld [vmem:[#allocation65_spill] sm:$0xff]  ;;  %v4511_v7 = vld [vmem:[#allocation66_spill] sm:$0xff] }
 0x4c0   : > { %1762 = vmatpush.bf16.msrb.mxu1 %v4488_v12  ;;  %1788 = vmatpush.bf16.msrb.mxu3 %v4489_v17  ;;  %v4512_v12 = vld [vmem:[#allocation71_spill] sm:$0xff]  ;;  %v4513_v17 = vld [vmem:[#allocation72_spill] sm:$0xff] }
 0x4c1   : > { %1699 = vmatmul.bf16.vlgmr.msra.gmra.mxu0 %v1687_v3  ;;  %1725 = vmatmul.bf16.vlgmr.msra.gmra.mxu2 %v1687_v3  ;;  %v4499_v3 = vld [vmem:[#allocation58_spill] sm:$0xff] }
 0x4c2   : > { %1751 = vmatpush.bf16.msrb.mxu0 %v4490_v25  ;;  %1777 = vmatpush.bf16.msrb.mxu2 %v4491_v34  ;;  %v4514_v25 = vld [vmem:[#allocation74_spill] sm:$0xff]  ;;  %v4515_v34 = vld [vmem:[#allocation76_spill] sm:$0xff] }
 0x4c4   : > { %1763 = vmatpush.bf16.msrb.mxu1 %v4492_v1  ;;  %1789 = vmatpush.bf16.msrb.mxu3 %v4493_v38  ;;  %v4516_v1 = vld [vmem:[#allocation73_spill] sm:$0xff]  ;;  %v4517_v38 = vld [vmem:[#allocation75_spill] sm:$0xff] }
 0x4c6   : > { %1752 = vmatpush.bf16.msrb.mxu0 %v4494_v33  ;;  %1778 = vmatpush.bf16.msrb.mxu2 %v4495_v15  ;;  %v4518_v33 = vld [vmem:[#allocation79_spill] sm:$0xff]  ;;  %v4519_v15 = vld [vmem:[#allocation80_spill] sm:$0xff] }
 0x4c7   : > { %1712 = vmatmul.bf16.vlgmr.msra.gmra.mxu1 %v1688_v8  ;;  %1738 = vmatmul.bf16.vlgmr.msra.gmra.mxu3 %v1688_v8  ;;  %v4506_v8 = vld [vmem:[#allocation63_spill] sm:$0xff] }
 0x4c8   : > { %1764 = vmatpush.bf16.msrb.mxu1 %v4496_v46  ;;  %1790 = vmatpush.bf16.msrb.mxu3 %v4497_v5  ;;  %v4520_v46 = vld [vmem:[#allocation77_spill] sm:$0xff]  ;;  %v4521_v5 = vld [vmem:[#allocation78_spill] sm:$0xff] }
 0x4ca   : > { %1753 = vmatpush.bf16.msrb.mxu0 %v4498_v27  ;;  %1779 = vmatpush.bf16.msrb.mxu2 %v4499_v3  ;;  %v4522_v27 = vld [vmem:[#allocation82_spill] sm:$0xff]  ;;  %v4523_v3 = vld [vmem:[#allocation83_spill] sm:$0xff] }
 0x4cc   : > { %1765 = vmatpush.bf16.msrb.mxu1 %v4500_v39  ;;  %1791 = vmatpush.bf16.msrb.mxu3 %v4501_v51  ;;  %v4524_v39 = vld [vmem:[#allocation85_spill] sm:$0xff]  ;;  %v4525_v51 = vld [vmem:[#allocation86_spill] sm:$0xff] }
 0x4ce   : > { %1754 = vmatpush.bf16.msrb.mxu0 %v4502_v62  ;;  %1780 = vmatpush.bf16.msrb.mxu2 %v4503_v24  ;;  %v4526_v62 = vld [vmem:[#allocation87_spill] sm:$0xff]  ;;  %v4527_v24 = vld [vmem:[#allocation88_spill] sm:$0xff] }
 0x4d0   : > { %1766 = vmatpush.bf16.msrb.mxu1 %v4506_v8  ;;  %1792 = vmatpush.bf16.msrb.mxu3 %v4507_v31  ;;  %v4530_v8 = vld [vmem:[#allocation91_spill] sm:$0xff]  ;;  %v4531_v31 = vld [vmem:[#allocation92_spill] sm:$0xff] }
 0x4d2   : > { %1803 = vmatpush.bf16.msra.mxu0 %v4504_v44  ;;  %1829 = vmatpush.bf16.msra.mxu2 %v4505_v50  ;;  %v4528_v44 = vld [vmem:[#allocation89_spill] sm:$0xff]  ;;  %v4529_v50 = vld [vmem:[#allocation90_spill] sm:$0xff] }
 0x4d4   : > { %1767 = vmatpush.bf16.msrb.mxu1 %v4510_v58  ;;  %1793 = vmatpush.bf16.msrb.mxu3 %v4511_v7  ;;  %v4534_v58 = vld [vmem:[#allocation95_spill] sm:$0xff]  ;;  %v4535_v7 = vld [vmem:[#allocation96_spill] sm:$0xff] }
 0x4d6   : > { %1804 = vmatpush.bf16.msra.mxu0 %v4508_v16  ;;  %1830 = vmatpush.bf16.msra.mxu2 %v4509_v21  ;;  %v4532_v16 = vld [vmem:[#allocation93_spill] sm:$0xff]  ;;  %v4533_v21 = vld [vmem:[#allocation94_spill] sm:$0xff] }
 0x4d8   : > { %1816 = vmatpush.bf16.msra.mxu1 %v4512_v12  ;;  %1842 = vmatpush.bf16.msra.mxu3 %v4513_v17  ;;  %v4536_v12 = vld [vmem:[#allocation97_spill] sm:$0xff]  ;;  %v4537_v17 = vld [vmem:[#allocation98_spill] sm:$0xff] }
 0x4da   : > { %1805 = vmatpush.bf16.msra.mxu0 %v4514_v25  ;;  %1831 = vmatpush.bf16.msra.mxu2 %v4515_v34  ;;  %v4538_v25 = vld [vmem:[#allocation99_spill] sm:$0xff]  ;;  %v4539_v34 = vld [vmem:[#allocation100_spill] sm:$0xff] }
 0x4dc   : > { %1817 = vmatpush.bf16.msra.mxu1 %v4516_v1  ;;  %1843 = vmatpush.bf16.msra.mxu3 %v4517_v38 }
 0x4de   : > { %1806 = vmatpush.bf16.msra.mxu0 %v4518_v33  ;;  %1832 = vmatpush.bf16.msra.mxu2 %v4519_v15 }
 0x4e0   : > { %1818 = vmatpush.bf16.msra.mxu1 %v4520_v46  ;;  %1844 = vmatpush.bf16.msra.mxu3 %v4521_v5 }
 0x4e2   : > { %1807 = vmatpush.bf16.msra.mxu0 %v4522_v27  ;;  %1833 = vmatpush.bf16.msra.mxu2 %v4523_v3 }
 0x4e4   : > { %1819 = vmatpush.bf16.msra.mxu1 %v4524_v39  ;;  %1845 = vmatpush.bf16.msra.mxu3 %v4525_v51 }
 0x4e6   : > { %1808 = vmatpush.bf16.msra.mxu0 %v4526_v62  ;;  %1834 = vmatpush.bf16.msra.mxu2 %v4527_v24 }
 0x4e8   : > { %1820 = vmatpush.bf16.msra.mxu1 %v4528_v44  ;;  %1846 = vmatpush.bf16.msra.mxu3 %v4529_v50 }
 0x4ea   : > { %1809 = vmatpush.bf16.msra.mxu0 %v4530_v8  ;;  %1835 = vmatpush.bf16.msra.mxu2 %v4531_v31 }
 0x4ec   : > { %1821 = vmatpush.bf16.msra.mxu1 %v4532_v16  ;;  %1847 = vmatpush.bf16.msra.mxu3 %v4533_v21 }
 0x4ee   : > { %1810 = vmatpush.bf16.msra.mxu0 %v4534_v58  ;;  %1836 = vmatpush.bf16.msra.mxu2 %v4535_v7 }
 0x4f0   : > { %1822 = vmatpush.bf16.msra.mxu1 %v4536_v12  ;;  %1848 = vmatpush.bf16.msra.mxu3 %v4537_v17 }
 0x4f4   : > { %1823 = vmatpush.bf16.msra.mxu1 %v4538_v25  ;;  %1849 = vmatpush.bf16.msra.mxu3 %v4539_v34 }
 0x52e   : > { %v1609_v1 = vpop.f32.mrf.mxu0 }
 0x52f   : > { %v1610_v38 = vadd.f32 1e-05, %v1609_v1 }
 0x534   : > { %v1622_v33 = vpop.f32.mrf.mxu1  ;;  %v1635_v15 = vpop.f32.mrf.mxu2 }
 0x535   : > { %v1623_v46 = vadd.f32 %v1622_v33, %v1610_v38  ;;  %v1636_v27 = vadd.f32 1e-05, %v1635_v15 }
 0x536   : > { %v1611_v5 = vpop.f32.mrf.mxu0 }
 0x537   : > { %2906 = vrsqrt.f32 %v1623_v46  ;;  %vm1658_vm9 = vweird.f32 %v1623_v46 }
 0x53a   : > { %v1648_v3 = vpop.f32.mrf.mxu3 }
 0x53b   : > { %v1649_v39 = vadd.f32 %v1648_v3, %v1636_v27 }
 0x53c   : > { %v1624_v51 = vpop.f32.mrf.mxu1  ;;  %v1637_v62 = vpop.f32.mrf.mxu2 }
 0x53d   : > { %v2907_v24 = vpop.eup %2906  ;;  %2908 = vrsqrt.f32 %v1649_v39  ;;  %vm1668_vm11 = vweird.f32 %v1649_v39 }
 0x53e   : > { %v1653_v44 = vmul.f32 %v2907_v24, %v1623_v46  ;;  %v1700_v50 = vpop.f32.mrf.mxu0  ;;  %vm1659_vm7 = vweird.f32 %v2907_v24 }
 0x53f   : > { %v1701_v31 = vadd.f32 %v1700_v50, %v4442_v6  ;;  %vm1660_vm10 = vmor %vm1658_vm9, %vm1659_vm7 }
 0x540   : > { %v1654_v8 = vmul.f32 %v2907_v24, %v1653_v44 }
 0x542   : > { %v1655_v16 = vmul.f32 0.5, %v1654_v8  ;;  %v1650_v21 = vpop.f32.mrf.mxu3 }
 0x543   : > { %v2909_v58 = vpop.eup %2908 }
 0x544   : > { %v1663_v7 = vmul.f32 %v2909_v58, %v1649_v39  ;;  %v1713_v12 = vpop.f32.mrf.mxu1  ;;  %v1726_v17 = vpop.f32.mrf.mxu2  ;;  %v1656_v34 = vsub.f32 1.5, %v1655_v16  ;;  %vm1669_vm8 = vweird.f32 %v2909_v58 }
 0x545   : > { %v1714_v25 = vadd.f32 %v1713_v12, %v1701_v31  ;;  %v1727_v15 = vadd.f32 %v1726_v17, %v4443_v28  ;;  %vm1670_vm12 = vmor %vm1668_vm11, %vm1669_vm8  ;;  %v1674_v17 = vld [vmem:[#allocation2] sm:$0xf] }
 0x546   : > { %v1664_v1 = vmul.f32 %v2909_v58, %v1663_v7  ;;  %v1702_v38 = vpop.f32.mrf.mxu0  ;;  %v1657_v3 = vmul.f32 %v2907_v24, %v1656_v34 }
 0x547   : > { %v1743_v33 = vmax.f32 %v1714_v25, 0.0 }
 0x548   : > { %v1665_v5 = vmul.f32 0.5, %v1664_v1  ;;  %v1661_v31 = vsel %vm1660_vm10, %v2907_v24, %v1657_v3 }
 0x549   : > { %v1745_v27 = vpack.c.bf16 %v1743_v33, %v1743_v33  ;;  %v1672_v46 = vmul.f32 %v1661_v31, %v3897_v29 }
 0x54a   : > { %v1666_v51 = vsub.f32 1.5, %v1665_v5  ;;  %v1739_v6 = vpop.f32.mrf.mxu3 }
 0x54b   : > { %v1740_v62 = vadd.f32 %v1739_v6, %v1727_v15  ;;  %1755 = vmatmul.bf16.vlgmr.msrb.gmra.mxu0 %v1745_v27  ;;  %1781 = vmatmul.bf16.vlgmr.msrb.gmra.mxu2 %v1745_v27 }
 0x54c   : > { %v1667_v44 = vmul.f32 %v2909_v58, %v1666_v51  ;;  %v1715_v50 = vpop.f32.mrf.mxu1  ;;  %v1728_v8 = vpop.f32.mrf.mxu2  ;;  %1865 = vmatpush.bf16.msrb.mxu0 %v3532_v36  ;;  %1891 = vmatpush.bf16.msrb.mxu2 %v3534_v55 }
 0x54d   : > { %v1744_v28 = vmax.f32 %v1740_v62, 0.0 }
 0x54e   : > { %v1671_v16 = vsel %vm1670_vm12, %v2909_v58, %v1667_v44 }
 0x54f   : > { %v1673_v21 = vmul.f32 %v1671_v16, %v3901_v45  ;;  %v1746_v7 = vpack.c.bf16 %v1744_v28, %v1744_v28 }
 0x550   : > { %1866 = vmatpush.bf16.msrb.mxu0 %v3537_v2  ;;  %1892 = vmatpush.bf16.msrb.mxu2 %v3540_v26 }
 0x551   : > { %v1677_v39 = vrot.slane %v1673_v21, 6  ;;  %1768 = vmatmul.bf16.vlgmr.msrb.gmra.mxu1 %v1746_v7  ;;  %1794 = vmatmul.bf16.vlgmr.msrb.gmra.mxu3 %v1746_v7 }
 0x552   : > { %v1741_v12 = vpop.f32.mrf.mxu3  ;;  %1878 = vmatpush.bf16.msrb.mxu1 %v3542_v60  ;;  %1904 = vmatpush.bf16.msrb.mxu3 %v3544_v32 }
 0x553   : > { %v1678_v24 = vsel %vm1354_vm6, %v1672_v46, %v1677_v39 }
 0x554   : > { %v1680_v58 = vadd.f32 %v1678_v24, %v1674_v17  ;;  %1867 = vmatpush.bf16.msrb.mxu0 %v3551_v11  ;;  %1893 = vmatpush.bf16.msrb.mxu2 %v3556_v49 }
 0x556   : > { %1681 = vst [vmem:[#allocation2] sm:$0xf] %v1680_v58  ;;  %1879 = vmatpush.bf16.msrb.mxu1 %v3548_v42  ;;  %1905 = vmatpush.bf16.msrb.mxu3 %v3553_v4 }
 0x558   : > { %1868 = vmatpush.bf16.msrb.mxu0 %v3568_v30  ;;  %1894 = vmatpush.bf16.msrb.mxu2 %v3571_v61 }
 0x55a   : > { %1880 = vmatpush.bf16.msrb.mxu1 %v3560_v53  ;;  %1906 = vmatpush.bf16.msrb.mxu3 %v3562_v40 }
 0x55c   : > { %1869 = vmatpush.bf16.msrb.mxu0 %v3577_v48  ;;  %1895 = vmatpush.bf16.msrb.mxu2 %v3580_v41 }
 0x55e   : > { %1881 = vmatpush.bf16.msrb.mxu1 %v4446_v10  ;;  %1907 = vmatpush.bf16.msrb.mxu3 %v4447_v35 }
 0x560   : > { %1870 = vmatpush.bf16.msrb.mxu0 %v4448_v57  ;;  %1896 = vmatpush.bf16.msrb.mxu2 %v3596_v59 }
 0x562   : > { %1882 = vmatpush.bf16.msrb.mxu1 %v3598_v14  ;;  %1908 = vmatpush.bf16.msrb.mxu3 %v4449_v9 }
 0x564   : > { %1871 = vmatpush.bf16.msrb.mxu0 %v3605_v43  ;;  %1897 = vmatpush.bf16.msrb.mxu2 %v4450_v13 }
 0x566   : > { %1883 = vmatpush.bf16.msrb.mxu1 %v3611_v18  ;;  %1909 = vmatpush.bf16.msrb.mxu3 %v3615_v22 }
 0x568   : > { %1872 = vmatpush.bf16.msrb.mxu0 %v3617_v20  ;;  %1898 = vmatpush.bf16.msrb.mxu2 %v3619_v47 }
 0x56a   : > { %1884 = vmatpush.bf16.msrb.mxu1 %v3623_v63  ;;  %1910 = vmatpush.bf16.msrb.mxu3 %v3626_v23 }
 0x56e   : > { %1885 = vmatpush.bf16.msrb.mxu1 %v3632_v0  ;;  %1911 = vmatpush.bf16.msrb.mxu3 %v3634_v54 }
 0x5c8   : > { %v1756_v29 = vpop.f32.mrf.mxu0 }
 0x5c9   : > { %v1757_v45 = vadd.f32 %v1756_v29, %v4451_v37 }
 0x5ce   : > { %v1769_v25 = vpop.f32.mrf.mxu1  ;;  %v1782_v34 = vpop.f32.mrf.mxu2 }
 0x5cf   : > { %v1770_v1 = vadd.f32 %v1769_v25, %v1757_v45  ;;  %v1783_v15 = vadd.f32 %v1782_v34, %v4452_v56 }
 0x5d0   : > { %v1758_v38 = vpop.f32.mrf.mxu0 }
 0x5d1   : > { %v1799_v33 = vmax.f32 %v1770_v1, 0.0 }
 0x5d3   : > { %v1801_v5 = vpack.c.bf16 %v1799_v33, %v1799_v33 }
 0x5d4   : > { %v1795_v27 = vpop.f32.mrf.mxu3 }
 0x5d5   : > { %v1796_v3 = vadd.f32 %v1795_v27, %v1783_v15  ;;  %1811 = vmatmul.bf16.vlgmr.msra.gmra.mxu0 %v1801_v5  ;;  %1837 = vmatmul.bf16.vlgmr.msra.gmra.mxu2 %v1801_v5 }
 0x5d6   : > { %v1771_v51 = vpop.f32.mrf.mxu1  ;;  %v1784_v6 = vpop.f32.mrf.mxu2  ;;  %1923 = vmatpush.bf16.msra.mxu0 %v3532_v36  ;;  %1949 = vmatpush.bf16.msra.mxu2 %v3534_v55 }
 0x5d7   : > { %v1800_v62 = vmax.f32 %v1796_v3, 0.0 }
 0x5d9   : > { %v1802_v37 = vpack.c.bf16 %v1800_v62, %v1800_v62 }
 0x5da   : > { %1924 = vmatpush.bf16.msra.mxu0 %v3537_v2  ;;  %1950 = vmatpush.bf16.msra.mxu2 %v3540_v26  ;;  %v1857_v2 = vld.sshfl [vmem:[#allocation1] sm:$0xff pattern:$0x73625140] }
 0x5db   : > { %1824 = vmatmul.bf16.vlgmr.msra.gmra.mxu1 %v1802_v37  ;;  %1850 = vmatmul.bf16.vlgmr.msra.gmra.mxu3 %v1802_v37 }
 0x5dc   : > { %v1797_v56 = vpop.f32.mrf.mxu3  ;;  %1936 = vmatpush.bf16.msra.mxu1 %v3542_v60  ;;  %1962 = vmatpush.bf16.msra.mxu3 %v3544_v32 }
 0x5dd   : > { %v1997_v56 = vld [vmem:[#allocation2] sm:$0xf] }
 0x5de   : > { %1925 = vmatpush.bf16.msra.mxu0 %v3551_v11  ;;  %1951 = vmatpush.bf16.msra.mxu2 %v3556_v49 }
 0x5e0   : > { %1937 = vmatpush.bf16.msra.mxu1 %v3548_v42  ;;  %1963 = vmatpush.bf16.msra.mxu3 %v3553_v4 }
 0x5e2   : > { %1926 = vmatpush.bf16.msra.mxu0 %v3568_v30  ;;  %1952 = vmatpush.bf16.msra.mxu2 %v3571_v61 }
 0x5e4   : > { %1938 = vmatpush.bf16.msra.mxu1 %v3560_v53  ;;  %1964 = vmatpush.bf16.msra.mxu3 %v3562_v40  ;;  %v1858_v53 = vld.sshfl [vmem:[#allocation1 + $0x8] sm:$0xff pattern:$0x73625140] }
 0x5e6   : > { %1927 = vmatpush.bf16.msra.mxu0 %v3577_v48  ;;  %1953 = vmatpush.bf16.msra.mxu2 %v3580_v41 }
 0x5e8   : > { %1939 = vmatpush.bf16.msra.mxu1 %v4446_v10  ;;  %1965 = vmatpush.bf16.msra.mxu3 %v4447_v35 }
 0x5ea   : > { %1928 = vmatpush.bf16.msra.mxu0 %v4448_v57  ;;  %1954 = vmatpush.bf16.msra.mxu2 %v3596_v59 }
 0x5ec   : > { %1940 = vmatpush.bf16.msra.mxu1 %v3598_v14  ;;  %1966 = vmatpush.bf16.msra.mxu3 %v4449_v9 }
 0x5ee   : > { %1929 = vmatpush.bf16.msra.mxu0 %v3605_v43  ;;  %1955 = vmatpush.bf16.msra.mxu2 %v4450_v13 }
 0x5f0   : > { %1941 = vmatpush.bf16.msra.mxu1 %v3611_v18  ;;  %1967 = vmatpush.bf16.msra.mxu3 %v3615_v22 }
 0x5f2   : > { %1930 = vmatpush.bf16.msra.mxu0 %v3617_v20  ;;  %1956 = vmatpush.bf16.msra.mxu2 %v3619_v47 }
 0x5f4   : > { %1942 = vmatpush.bf16.msra.mxu1 %v3623_v63  ;;  %1968 = vmatpush.bf16.msra.mxu3 %v3626_v23 }
 0x5f8   : > { %1943 = vmatpush.bf16.msra.mxu1 %v3632_v0  ;;  %1969 = vmatpush.bf16.msra.mxu3 %v3634_v54 }
 0x652   : > { %v1812_v26 = vpop.f32.mrf.mxu0 }
 0x653   : > { %v1813_v55 = vadd.f32 %v1812_v26, %v4453_v52 }
 0x658   : > { %v1825_v36 = vpop.f32.mrf.mxu1  ;;  %v1838_v60 = vpop.f32.mrf.mxu2 }
 0x659   : > { %v1826_v32 = vadd.f32 %v1825_v36, %v1813_v55  ;;  %v1839_v47 = vadd.f32 %v1838_v60, %v3670_v19  ;;  %v2914_v36 = vld [vmem:[#allocation8 + $0x8] sm:$0xff] }
 0x65a   : > { %v1814_v42 = vpop.f32.mrf.mxu0  ;;  %v2019_v60 = vperm.slane %v2914_v36, 4 }
 0x65b   : > { %v1861_v11 = vadd.f32 %v1857_v2, %v1826_v32  ;;  %v2011_v2 = vperm.slane %v2914_v36, 3  ;;  %v2915_v32 = vld [vmem:[#allocation8] sm:$0xff] }
 0x65c   : > { %v2010_v42 = vperm.slane %v2915_v32, 3 }
 0x65d   : > { %v1863_v4 = vpack.c.bf16 %v1861_v11, %v1861_v11 }
 0x65e   : > { %v1851_v49 = vpop.f32.mrf.mxu3 }
 0x65f   : > { %v1852_v40 = vadd.f32 %v1851_v49, %v1839_v47  ;;  %1873 = vmatmul.bf16.vlgmr.msrb.gmra.mxu0 %v1863_v4  ;;  %1899 = vmatmul.bf16.vlgmr.msrb.gmra.mxu2 %v1863_v4  ;;  %v2018_v4 = vperm.slane %v2915_v32, 4  ;;  %v2022_v47 = vrot.slane %v2019_v60, 6 }
 0x660   : > { %v1827_v30 = vpop.f32.mrf.mxu1  ;;  %v1840_v61 = vpop.f32.mrf.mxu2 }
 0x661   : > { %v1862_v48 = vadd.f32 %v1858_v53, %v1852_v40  ;;  %v2023_v30 = vsel %vm1354_vm6, %v2018_v4, %v2022_v47 }
 0x663   : > { %v1864_v41 = vpack.c.bf16 %v1862_v48, %v1862_v48 }
 0x665   : > { %1886 = vmatmul.bf16.vlgmr.msrb.gmra.mxu1 %v1864_v41  ;;  %1912 = vmatmul.bf16.vlgmr.msrb.gmra.mxu3 %v1864_v41 }
 0x666   : > { %v1853_v59 = vpop.f32.mrf.mxu3 }
 0x6dc   : > { %v1874_v14 = vpop.f32.mrf.mxu0 }
 0x6e2   : > { %v1887_v43 = vpop.f32.mrf.mxu1  ;;  %v1900_v18 = vpop.f32.mrf.mxu2 }
 0x6e3   : > { %v1888_v22 = vadd.f32 %v1887_v43, %v1874_v14 }
 0x6e4   : > { %v1876_v20 = vpop.f32.mrf.mxu0 }
 0x6e5   : > { %v1917_v63 = vsub.f32 %v1861_v11, %v1888_v22  ;;  %v2014_v11 = vrot.slane %v2011_v2, 6 }
 0x6e7   : > { %v1919_v23 = vmul.f32 %v1917_v63, %v1917_v63  ;;  %v2015_v53 = vsel %vm1354_vm6, %v2010_v42, %v2014_v11 }
 0x6e8   : > { %v1913_v0 = vpop.f32.mrf.mxu3 }
 0x6e9   : > { %v1921_v54 = vpack.c.bf16 %v1919_v23, %v1919_v23  ;;  %v1914_v19 = vadd.f32 %v1913_v0, %v1900_v18 }
 0x6ea   : > { %v1889_v10 = vpop.f32.mrf.mxu1  ;;  %v1902_v35 = vpop.f32.mrf.mxu2 }
 0x6eb   : > { %v1918_v57 = vsub.f32 %v1862_v48, %v1914_v19  ;;  %1931 = vmatmul.bf16.vlgmr.msra.gmra.mxu0 %v1921_v54  ;;  %1957 = vmatmul.bf16.vlgmr.msra.gmra.mxu2 %v1921_v54 }
 0x6ed   : > { %v1920_v9 = vmul.f32 %v1918_v57, %v1918_v57 }
 0x6ef   : > { %v1922_v13 = vpack.c.bf16 %v1920_v9, %v1920_v9 }
 0x6f0   : > { %v1915_v52 = vpop.f32.mrf.mxu3 }
 0x6f1   : > { %1944 = vmatmul.bf16.vlgmr.msra.gmra.mxu1 %v1922_v13  ;;  %1970 = vmatmul.bf16.vlgmr.msra.gmra.mxu3 %v1922_v13 }
 0x768   : > { %v1932_v44 = vpop.f32.mrf.mxu0 }
 0x769   : > { %v1933_v50 = vadd.f32 1e-05, %v1932_v44 }
 0x76e   : > { %v1945_v8 = vpop.f32.mrf.mxu1  ;;  %v1958_v28 = vpop.f32.mrf.mxu2 }
 0x76f   : > { %v1946_v31 = vadd.f32 %v1945_v8, %v1933_v50  ;;  %v1959_v21 = vadd.f32 1e-05, %v1958_v28 }
 0x770   : > { %v1934_v16 = vpop.f32.mrf.mxu0 }
 0x771   : > { %2910 = vrsqrt.f32 %v1946_v31  ;;  %vm1981_vm15 = vweird.f32 %v1946_v31 }
 0x774   : > { %v1971_v7 = vpop.f32.mrf.mxu3 }
 0x775   : > { %v1972_v46 = vadd.f32 %v1971_v7, %v1959_v21 }
 0x776   : > { %v1947_v39 = vpop.f32.mrf.mxu1  ;;  %v1960_v12 = vpop.f32.mrf.mxu2 }
 0x777   : > { %v2911_v17 = vpop.eup %2910  ;;  %2912 = vrsqrt.f32 %v1972_v46  ;;  %vm1991_vm1 = vweird.f32 %v1972_v46 }
 0x778   : > { %v1976_v24 = vmul.f32 %v2911_v17, %v1946_v31  ;;  %vm1982_vm13 = vweird.f32 %v2911_v17 }
 0x779   : > { %vm1983_vm0 = vmor %vm1981_vm15, %vm1982_vm13 }
 0x77a   : > { %v1977_v58 = vmul.f32 %v2911_v17, %v1976_v24 }
 0x77c   : > { %v1978_v29 = vmul.f32 0.5, %v1977_v58  ;;  %v1973_v45 = vpop.f32.mrf.mxu3 }
 0x77d   : > { %v2913_v25 = vpop.eup %2912 }
 0x77e   : > { %v1986_v34 = vmul.f32 %v2913_v25, %v1972_v46  ;;  %v1979_v1 = vsub.f32 1.5, %v1978_v29  ;;  %vm1992_vm14 = vweird.f32 %v2913_v25 }
 0x77f   : > { %vm1993_vm2 = vmor %vm1991_vm1, %vm1992_vm14 }
 0x780   : > { %v1987_v38 = vmul.f32 %v2913_v25, %v1986_v34  ;;  %v1980_v15 = vmul.f32 %v2911_v17, %v1979_v1 }
 0x782   : > { %v1988_v33 = vmul.f32 0.5, %v1987_v38  ;;  %v1984_v3 = vsel %vm1983_vm0, %v2911_v17, %v1980_v15 }
 0x783   : > { %v1995_v62 = vmul.f32 %v1984_v3, %v1917_v63 }
 0x784   : > { %v1989_v5 = vsub.f32 1.5, %v1988_v33 }
 0x786   : > { %v1990_v27 = vmul.f32 %v2913_v25, %v1989_v5 }
 0x788   : > { %v1994_v51 = vsel %vm1993_vm2, %v2913_v25, %v1990_v27 }
 0x789   : > { %v1996_v6 = vmul.f32 %v1994_v51, %v1918_v57 }
 0x78b   : > { %v2000_v37 = vrot.slane %v1996_v6, 6 }
 0x78d   : > { %v2001_v26 = vsel %vm1354_vm6, %v1995_v62, %v2000_v37 }
 0x78e   : > { %v2003_v55 = vadd.f32 %v2001_v26, %v1997_v56 }
 0x790   : > { %2004 = vst [vmem:[#allocation2] sm:$0xf] %v2003_v55 }
 0x797   : > { %v2008_v49 = vld [vmem:[#allocation2] sm:$0xf] }
 0x798   : > { %v2009_v40 = vmul.f32 0.33333334, %v2008_v49 }
 0x79a   : > { %v2017_v61 = vmul.f32 %v2015_v53, %v2009_v40 }
 0x79c   : > { %v2025_v48 = vadd.f32 %v2023_v30, %v2017_v61 }
 0x79e   : > { %2026 = vst [vmem:[%s250_s30] sm:$0xf] %v2025_v48 }
 0x79f   : > { %3033 = shalt.err (!%p3030_p0)
}
 0x7a0   : > { %2824 = dma.vmem_to_hbm [thread:$0]  (%p3200_p7), %s2044_s4, 64, %s2046_s5, %s2028_s15  }
 0x7a1 PF: > { %s2057_s11 = sand.u32 1, %s3072_s12   ;;  %p2838_p3 = pnand %p2158_p11, %p3170_p6 }
 0x7a2   : > { %s2058_s29 = scalar_lea.sflag [#allocation5], %s2057_s11 }
 0x7a3   : > { %p2839_p5 = pneg %p2838_p3 }
 0x7a5   : > { %3067 = dma.done.wait (%p2839_p5), %s2058_s29, 64  }
 0x7a6   : > { %3069 = vsyncadd (%p2839_p5), %s2058_s29, 4294967232  ;;  %s20_s17 = sadd.s32 1, %s3092_s17   ;;  %s4540_s12 = smov %s3076_s13 }
 0x7a7   : > { %p17_p9 = scmp.ge.s32.totalorder %s20_s17, 4   ;;  %s4541_s13 = smov %s3080_s14 }
 0x7a8   : > { %s4542_s14 = smov %s3208_s26  ;;  %s4543_s15 = smov %s3088_s16 }
 0x7a9   : > { %s4544_s16 = smov %s4546_s10  ;;  %19 = sbr.rel (!%p17_p9) target bundleno = 7 (0x7), region = 98 }
 0x7ae   :  { %2064 = vsyncpa [#allocation4], 1 }
 0x7af   :  { %2066 = vsyncpa [#allocation4 + $0x1], 1 }
 0x7b0   :  { %2067 = vsyncpa [#allocation7], 1 }
 0x7b1   :  { %2068 = vsyncpa [#allocation5], 1 }
 0x7b2   :  { %2070 = vsyncpa [#allocation5 + $0x1], 1 }

</bundles_post_ra>
